<compile_context>
chip_gen: v7x
topology: tpu7x:2x2x1
jax: 0.10.0
libtpu: 0.0.40
codegen_flags: <defaults>
</compile_context>

<pallas_src>
import functools

import jax
import jax.numpy as jnp
from jax.experimental import pallas as pl
from jax.experimental.pallas import tpu as pltpu

LANE = 128


def _round_up(x, m):
    return ((x + m - 1) // m) * m


def _pad2d(a, rows, cols):
    r, c = a.shape
    if r == rows and c == cols:
        return a
    return jnp.pad(a, ((0, rows - r), (0, cols - c)))


# ----------------------------------------------------------------------------
# Small-graph path: whole network fused into a single kernel (all VMEM-resident)
# ----------------------------------------------------------------------------
def _fused_small_kernel(a_ref, x_ref,
                        w1_ref, b1_ref, g2_ref, be2_ref,
                        wm_ref, bm_ref, g3_ref, be3_ref,
                        w2_ref, b2_ref, o_ref, *, eps, n_valid):
    a = a_ref[...]  # bf16, padded rows/cols are exactly zero

    def conv(h_f32, w_ref, b_ref):
        xw = jnp.dot(h_f32.astype(jnp.bfloat16), w_ref[...],
                     preferred_element_type=jnp.float32)
        return jnp.dot(a, xw.astype(jnp.bfloat16),
                       preferred_element_type=jnp.float32) + b_ref[...]

    def bn(h, g_ref, b_ref):
        # Training-mode batch stats (biased variance), masked to real rows.
        rows = jax.lax.broadcasted_iota(jnp.int32, h.shape, 0)
        mask = (rows < n_valid).astype(jnp.float32)
        inv_n = 1.0 / float(n_valid)
        mean = jnp.sum(h * mask, axis=0, keepdims=True) * inv_n
        diff = (h - mean) * mask
        var = jnp.sum(diff * diff, axis=0, keepdims=True) * inv_n
        inv = jax.lax.rsqrt(var + eps)
        return (h - mean) * inv * g_ref[...] + b_ref[...]

    h = conv(x_ref[...].astype(jnp.float32), w1_ref, b1_ref)   # conv1
    h = bn(h, g2_ref, be2_ref)                                 # norm_layer_2
    h = conv(h, wm_ref, bm_ref)                                 # conv_mid
    h = bn(h, g3_ref, be3_ref)                                 # norm_layer_3
    o_ref[...] = conv(h, w2_ref, b2_ref)                        # conv2


def _gcn_forward_small(a_hat, x_p, w1, b1, g2, be2, wm, bm, g3, be3, w2, b2,
                       n_valid, eps):
    n_pad = a_hat.shape[0]
    f_in_p = x_p.shape[1]
    hid_p = w1.shape[1]
    f_out_p = w2.shape[1]

    def full(shape):
        return pl.BlockSpec(shape, lambda i: (0, 0))

    return pl.pallas_call(
        functools.partial(_fused_small_kernel, eps=eps, n_valid=n_valid),
        out_shape=jax.ShapeDtypeStruct((n_pad, f_out_p), jnp.float32),
        grid=(1,),
        in_specs=[
            full((n_pad, n_pad)),      # A_hat (bf16)
            full((n_pad, f_in_p)),     # X
            full((f_in_p, hid_p)),     # W1
            full((1, hid_p)),          # b1
            full((1, hid_p)),          # gamma2
            full((1, hid_p)),          # beta2
            full((hid_p, hid_p)),      # W_mid
            full((1, hid_p)),          # b_mid
            full((1, hid_p)),          # gamma3
            full((1, hid_p)),          # beta3
            full((hid_p, f_out_p)),    # W2
            full((1, f_out_p)),        # b2
        ],
        out_specs=full((n_pad, f_out_p)),
        compiler_params=pltpu.CompilerParams(
            dimension_semantics=("arbitrary",),
            vmem_limit_bytes=32 * 1024 * 1024,
        ),
    )(a_hat, x_p,
      w1, b1.reshape(1, hid_p), g2.reshape(1, hid_p), be2.reshape(1, hid_p),
      wm, bm.reshape(1, hid_p), g3.reshape(1, hid_p), be3.reshape(1, hid_p),
      w2, b2.reshape(1, f_out_p))


# ----------------------------------------------------------------------------
# Large-graph path: fused (BN-apply + XW + aggregation) conv kernel
# ----------------------------------------------------------------------------
def _conv_kernel(a_ref, x_ref, scale_ref, shift_ref, w_ref, b_ref, o_ref,
                 acc_ref):
    # Per (row tile i, K tile k):
    #   H_k     = X_k * scale + shift        (folded BatchNorm affine)
    #   XW_k    = H_k @ W                    (W VMEM-resident, MXU otherwise idle)
    #   acc    += A[i, k] @ XW_k             (f32 VMEM accumulator)
    # Finalize with bias on the last K step; output written once (bf16/f32).
    k = pl.program_id(1)

    xh = x_ref[...].astype(jnp.float32) * scale_ref[...] + shift_ref[...]
    xw = jnp.dot(xh.astype(jnp.bfloat16), w_ref[...],
                 preferred_element_type=jnp.float32)
    part = jnp.dot(a_ref[...], xw.astype(jnp.bfloat16),
                   preferred_element_type=jnp.float32)

    @pl.when(k == 0)
    def _():
        acc_ref[...] = part

    @pl.when(k != 0)
    def _():
        acc_ref[...] += part

    @pl.when(k == pl.num_programs(1) - 1)
    def _():
        o_ref[...] = (acc_ref[...] + b_ref[...]).astype(o_ref.dtype)


def gcn_conv(a_hat_bf16, x_bf16, scale, shift, w_bf16, b2d, *, tm, tk,
             out_dtype):
    """out = A_hat @ ((x*scale + shift) @ W) + b on padded shapes."""
    n_pad = a_hat_bf16.shape[0]
    f_in_p = x_bf16.shape[1]
    f_out_p = w_bf16.shape[1]

    return pl.pallas_call(
        _conv_kernel,
        out_shape=jax.ShapeDtypeStruct((n_pad, f_out_p), out_dtype),
        grid=(n_pad // tm, n_pad // tk),
        in_specs=[
            pl.BlockSpec((tm, tk), lambda i, k: (i, k)),          # A_hat tile
            pl.BlockSpec((tk, f_in_p), lambda i, k: (k, 0)),      # X K-slice
            pl.BlockSpec((1, f_in_p), lambda i, k: (0, 0)),       # BN scale
            pl.BlockSpec((1, f_in_p), lambda i, k: (0, 0)),       # BN shift
            pl.BlockSpec((f_in_p, f_out_p), lambda i, k: (0, 0)),  # W (resident)
            pl.BlockSpec((1, f_out_p), lambda i, k: (0, 0)),      # bias
        ],
        out_specs=pl.BlockSpec((tm, f_out_p), lambda i, k: (i, 0)),
        scratch_shapes=[pltpu.VMEM((tm, f_out_p), jnp.float32)],
        compiler_params=pltpu.CompilerParams(
            dimension_semantics=("parallel", "arbitrary"),
            vmem_limit_bytes=32 * 1024 * 1024,
        ),
        cost_estimate=pl.CostEstimate(
            flops=2 * n_pad * n_pad * f_out_p
            + 2 * (n_pad // tm) * n_pad * f_in_p * f_out_p,
            transcendentals=0,
            bytes_accessed=2 * n_pad * n_pad
            + 2 * (n_pad // tm) * n_pad * f_in_p
            + n_pad * f_out_p * jnp.dtype(out_dtype).itemsize,
        ),
    )(a_hat_bf16, x_bf16, scale, shift, w_bf16, b2d)


# ----------------------------------------------------------------------------
# Large-graph BatchNorm: tiled stats pass (apply is folded into the next conv)
# ----------------------------------------------------------------------------
def _bn_stats_kernel(x_ref, sum_ref, sq_ref, *, n_valid, rows_per_blk):
    i = pl.program_id(0)
    x = x_ref[...].astype(jnp.float32)
    rows = jax.lax.broadcasted_iota(jnp.int32, x.shape, 0) + i * rows_per_blk
    mask = (rows < n_valid).astype(jnp.float32)
    xm = x * mask
    s = jnp.sum(xm, axis=0, keepdims=True)
    q = jnp.sum(xm * xm, axis=0, keepdims=True)

    @pl.when(i == 0)
    def _():
        sum_ref[...] = s
        sq_ref[...] = q

    @pl.when(i != 0)
    def _():
        sum_ref[...] += s
        sq_ref[...] += q


def bn_scale_shift(h, gamma, beta, n_valid, eps=1e-5, tr=512):
    """Return per-feature (scale, shift) of training-mode BatchNorm1d."""
    n_pad, f_pad = h.shape
    tr = min(tr, n_pad)
    s, q = pl.pallas_call(
        functools.partial(_bn_stats_kernel, n_valid=n_valid, rows_per_blk=tr),
        out_shape=(jax.ShapeDtypeStruct((1, f_pad), jnp.float32),
                   jax.ShapeDtypeStruct((1, f_pad), jnp.float32)),
        grid=(n_pad // tr,),
        in_specs=[pl.BlockSpec((tr, f_pad), lambda i: (i, 0))],
        out_specs=(pl.BlockSpec((1, f_pad), lambda i: (0, 0)),
                   pl.BlockSpec((1, f_pad), lambda i: (0, 0))),
        compiler_params=pltpu.CompilerParams(
            dimension_semantics=("arbitrary",)),
    )(h)
    inv_n = 1.0 / float(n_valid)
    mean = s * inv_n
    var = jnp.maximum(q * inv_n - mean * mean, 0.0)   # biased variance
    inv = jax.lax.rsqrt(var + eps)
    scale = inv * gamma.reshape(1, f_pad)
    shift = beta.reshape(1, f_pad) - mean * scale
    return scale, shift


# ----------------------------------------------------------------------------
# Glue: adjacency normalization (GCNAdjNorm semantics: D^-1/2 (A + I) D^-1/2)
# ----------------------------------------------------------------------------
def gcn_adj_norm(edge_index, num_nodes):
    src, dst = edge_index[0], edge_index[1]
    a = jnp.zeros((num_nodes, num_nodes), jnp.float32)
    a = a.at[dst, src].set(1.0)
    a = a + jnp.eye(num_nodes, dtype=jnp.float32)  # self loops
    deg = jnp.sum(a, axis=1)
    dinv = jnp.where(deg > 0, 1.0 / jnp.sqrt(deg), 0.0)
    return a * dinv[:, None] * dinv[None, :]


def _pick_tiles(n_pad):
    # Biggest A tiles that keep >=4 row tiles (v7x megacore balance) and stay
    # well under the 32 MiB scoped-VMEM budget set on the conv kernel.
    tk = max(t for t in (2048, 1024, 512) if n_pad % t == 0)
    tm = 256
    for t in (1024, 512, 256):
        if n_pad % t == 0 and n_pad // t >= 4:
            tm = t
            break
    return tm, tk


# ----------------------------------------------------------------------------
# GCN model (deterministic parameter init)
# ----------------------------------------------------------------------------
def init_gcn_params(key, in_channels, out_channels, hidden_dim=128):
    ks = jax.random.split(key, 3)

    def glorot(k, fan_in, fan_out):
        lim = jnp.sqrt(6.0 / (fan_in + fan_out))
        return jax.random.uniform(k, (fan_in, fan_out), jnp.float32, -lim, lim)

    return {
        "w1": glorot(ks[0], in_channels, hidden_dim),
        "b1": jnp.zeros((hidden_dim,), jnp.float32),
        "bn2_g": jnp.ones((hidden_dim,), jnp.float32),
        "bn2_b": jnp.zeros((hidden_dim,), jnp.float32),
        "w_mid": glorot(ks[1], hidden_dim, hidden_dim),
        "b_mid": jnp.zeros((hidden_dim,), jnp.float32),
        "bn3_g": jnp.ones((hidden_dim,), jnp.float32),
        "bn3_b": jnp.zeros((hidden_dim,), jnp.float32),
        "w2": glorot(ks[2], hidden_dim, out_channels),
        "b2": jnp.zeros((out_channels,), jnp.float32),
    }


def gcn_forward(params, x, pos_edge_index, eps=1e-5):
    n, f_in = x.shape
    hid = params["w1"].shape[1]
    f_out = params["w2"].shape[1]

    f_in_p = _round_up(f_in, LANE)
    hid_p = _round_up(hid, LANE)
    f_out_p = _round_up(f_out, LANE)

    # Padded params: bf16 weights for the MXU, f32 biases / BN affines.
    w1 = _pad2d(params["w1"], f_in_p, hid_p).astype(jnp.bfloat16)
    wm = _pad2d(params["w_mid"], hid_p, hid_p).astype(jnp.bfloat16)
    w2 = _pad2d(params["w2"], hid_p, f_out_p).astype(jnp.bfloat16)
    b1 = jnp.pad(params["b1"], (0, hid_p - hid)).astype(jnp.float32)
    bm = jnp.pad(params["b_mid"], (0, hid_p - hid)).astype(jnp.float32)
    b2 = jnp.pad(params["b2"], (0, f_out_p - f_out)).astype(jnp.float32)
    g2 = jnp.pad(params["bn2_g"], (0, hid_p - hid)).astype(jnp.float32)
    be2 = jnp.pad(params["bn2_b"], (0, hid_p - hid)).astype(jnp.float32)
    g3 = jnp.pad(params["bn3_g"], (0, hid_p - hid)).astype(jnp.float32)
    be3 = jnp.pad(params["bn3_b"], (0, hid_p - hid)).astype(jnp.float32)

    if n <= 512:
        # Whole-network fusion: single pallas_call, everything VMEM-resident.
        n_pad = _round_up(n, LANE)
        a_hat = _pad2d(gcn_adj_norm(pos_edge_index, n), n_pad, n_pad)
        a_hat = a_hat.astype(jnp.bfloat16)
        x_p = _pad2d(x, n_pad, f_in_p).astype(jnp.float32)
        out = _gcn_forward_small(a_hat, x_p, w1, b1, g2, be2, wm, bm,
                                 g3, be3, w2, b2, n, eps)
        return out[:n, :f_out]

    # ---- Tiled path for large graphs -------------------------------------
    n_pad = _round_up(n, 512)
    tm, tk = _pick_tiles(n_pad)

    a_hat = _pad2d(gcn_adj_norm(pos_edge_index, n), n_pad, n_pad)
    a_hat = a_hat.astype(jnp.bfloat16)          # cast once, reused by 3 convs
    x_p = _pad2d(x, n_pad, f_in_p).astype(jnp.bfloat16)

    ones_in = jnp.ones((1, f_in_p), jnp.float32)
    zeros_in = jnp.zeros((1, f_in_p), jnp.float32)

    # conv1 (identity pre-affine); bf16 intermediate H to halve HBM traffic.
    h1 = gcn_conv(a_hat, x_p, ones_in, zeros_in, w1, b1.reshape(1, hid_p),
                  tm=tm, tk=tk, out_dtype=jnp.bfloat16)
    # norm_layer_2: batch stats; affine folded into conv_mid's XW step.
    s2, t2 = bn_scale_shift(h1, g2, be2, n, eps)
    h2 = gcn_conv(a_hat, h1, s2, t2, wm, bm.reshape(1, hid_p),
                  tm=tm, tk=tk, out_dtype=jnp.bfloat16)
    # norm_layer_3: stats; affine folded into conv2's XW step.
    s3, t3 = bn_scale_shift(h2, g3, be3, n, eps)
    out = gcn_conv(a_hat, h2, s3, t3, w2, b2.reshape(1, f_out_p),
                   tm=tm, tk=tk, out_dtype=jnp.float32)
    return out[:n, :f_out]


# ----------------------------------------------------------------------------
if __name__ == "__main__":
    key = jax.random.PRNGKey(0)
    k_x, k_e, k_p, k_x2, k_e2 = jax.random.split(key, 5)

    num_nodes = 16
    in_channels = 8
    hidden_dim = 32
    out_channels = 8
    num_edges = 40

    x = jax.random.normal(k_x, (num_nodes, in_channels), jnp.float32)
    pos_edge_index = jax.random.randint(
        k_e, (2, num_edges), 0, num_nodes, dtype=jnp.int32
    )

    params = init_gcn_params(k_p, in_channels, out_channels, hidden_dim)

    # Small-graph fused path (the benchmark size).
    out = gcn_forward(params, x, pos_edge_index)
    jax.block_until_ready(out)
    assert out.shape == (num_nodes, out_channels)
    assert bool(jnp.all(jnp.isfinite(out)))

    # Also exercise the tiled large-graph path once (n_pad = 1024).
    n_big = 640
    x_big = jax.random.normal(k_x2, (n_big, in_channels), jnp.float32)
    e_big = jax.random.randint(k_e2, (2, 4 * n_big), 0, n_big, dtype=jnp.int32)
    out_big = gcn_forward(params, x_big, e_big)
    jax.block_until_ready(out_big)
    assert out_big.shape == (n_big, out_channels)
    assert bool(jnp.all(jnp.isfinite(out_big)))

    print("KERNEL_OK")
</pallas_src>

<mosaic_0001>
module attributes {stable_mosaic.version = 11 : i64} {
  func.func @_fused_small_kernel(%arg0: i32, %arg1: memref<128x128xbf16, #tpu.memory_space<vmem>>, %arg2: memref<128x128xf32, #tpu.memory_space<vmem>>, %arg3: memref<128x128xbf16, #tpu.memory_space<vmem>>, %arg4: memref<1x128xf32, #tpu.memory_space<vmem>>, %arg5: memref<1x128xf32, #tpu.memory_space<vmem>>, %arg6: memref<1x128xf32, #tpu.memory_space<vmem>>, %arg7: memref<128x128xbf16, #tpu.memory_space<vmem>>, %arg8: memref<1x128xf32, #tpu.memory_space<vmem>>, %arg9: memref<1x128xf32, #tpu.memory_space<vmem>>, %arg10: memref<1x128xf32, #tpu.memory_space<vmem>>, %arg11: memref<128x128xbf16, #tpu.memory_space<vmem>>, %arg12: memref<1x128xf32, #tpu.memory_space<vmem>>, %arg13: memref<128x128xf32, #tpu.memory_space<vmem>>) attributes {dimension_semantics = [#tpu.dimension_semantics<arbitrary>], iteration_bounds = array<i64: 1>, scalar_prefetch = 0 : i64, scratch_operands = 0 : i64, tpu.core_type = #tpu.core_type<tc>, window_params = [{pipeline_mode = #tpu.pipeline_mode<synchronous>, transform_indices = @transform_0, window_bounds = array<i64: 128, 128>}, {pipeline_mode = #tpu.pipeline_mode<synchronous>, transform_indices = @transform_1, window_bounds = array<i64: 128, 128>}, {pipeline_mode = #tpu.pipeline_mode<synchronous>, transform_indices = @transform_2, window_bounds = array<i64: 128, 128>}, {pipeline_mode = #tpu.pipeline_mode<synchronous>, transform_indices = @transform_3, window_bounds = array<i64: 1, 128>}, {pipeline_mode = #tpu.pipeline_mode<synchronous>, transform_indices = @transform_4, window_bounds = array<i64: 1, 128>}, {pipeline_mode = #tpu.pipeline_mode<synchronous>, transform_indices = @transform_5, window_bounds = array<i64: 1, 128>}, {pipeline_mode = #tpu.pipeline_mode<synchronous>, transform_indices = @transform_6, window_bounds = array<i64: 128, 128>}, {pipeline_mode = #tpu.pipeline_mode<synchronous>, transform_indices = @transform_7, window_bounds = array<i64: 1, 128>}, {pipeline_mode = #tpu.pipeline_mode<synchronous>, transform_indices = @transform_8, window_bounds = array<i64: 1, 128>}, {pipeline_mode = #tpu.pipeline_mode<synchronous>, transform_indices = @transform_9, window_bounds = array<i64: 1, 128>}, {pipeline_mode = #tpu.pipeline_mode<synchronous>, transform_indices = @transform_10, window_bounds = array<i64: 128, 128>}, {pipeline_mode = #tpu.pipeline_mode<synchronous>, transform_indices = @transform_11, window_bounds = array<i64: 1, 128>}, {pipeline_mode = #tpu.pipeline_mode<synchronous>, transform_indices = @transform_12, window_bounds = array<i64: 128, 128>}]} {
    %c0 = arith.constant 0 : index
    %c0_0 = arith.constant 0 : index
    %0 = vector.load %arg1[%c0, %c0_0] : memref<128x128xbf16, #tpu.memory_space<vmem>>, vector<128x128xbf16>
    %c0_1 = arith.constant 0 : index
    %c0_2 = arith.constant 0 : index
    %1 = vector.load %arg2[%c0_1, %c0_2] : memref<128x128xf32, #tpu.memory_space<vmem>>, vector<128x128xf32>
    %2 = arith.truncf %1 : vector<128x128xf32> to vector<128x128xbf16>
    %c0_3 = arith.constant 0 : index
    %c0_4 = arith.constant 0 : index
    %3 = vector.load %arg3[%c0_3, %c0_4] : memref<128x128xbf16, #tpu.memory_space<vmem>>, vector<128x128xbf16>
    %cst = arith.constant dense<0.000000e+00> : vector<128x128xf32>
    %4 = tpu.matmul %2, %3, %cst {dimension_numbers = #tpu.dot_dimension_numbers<[1], [0], [0], [1], [0, 0, 1, 1], [], []>} : vector<128x128xbf16>, vector<128x128xbf16>, vector<128x128xf32> -> vector<128x128xf32>
    %5 = arith.truncf %4 : vector<128x128xf32> to vector<128x128xbf16>
    %cst_5 = arith.constant dense<0.000000e+00> : vector<128x128xf32>
    %6 = tpu.matmul %0, %5, %cst_5 {dimension_numbers = #tpu.dot_dimension_numbers<[1], [0], [0], [1], [0, 0, 1, 1], [], []>} : vector<128x128xbf16>, vector<128x128xbf16>, vector<128x128xf32> -> vector<128x128xf32>
    %c0_6 = arith.constant 0 : index
    %c0_7 = arith.constant 0 : index
    %7 = vector.load %arg4[%c0_6, %c0_7] : memref<1x128xf32, #tpu.memory_space<vmem>>, vector<1x128xf32>
    %8 = vector.broadcast %7 : vector<1x128xf32> to vector<128x128xf32>
    %9 = arith.addf %6, %8 : vector<128x128xf32>
    %10 = tpu.iota {dimensions = array<i32: 0>} : vector<128x128xi32>
    %c16_i32 = arith.constant 16 : i32
    %11 = vector.broadcast %c16_i32 : i32 to vector<128x128xi32>
    %12 = arith.cmpi slt, %10, %11 : vector<128x128xi32>
    %13 = arith.extui %12 : vector<128x128xi1> to vector<128x128xi32>
    %14 = arith.sitofp %13 : vector<128x128xi32> to vector<128x128xf32>
    %15 = arith.mulf %9, %14 : vector<128x128xf32>
    %cst_8 = arith.constant dense<0.000000e+00> : vector<128xf32>
    %16 = vector.multi_reduction <add>, %15, %cst_8 [0] : vector<128x128xf32> to vector<128xf32>
    %17 = vector.shape_cast %16 : vector<128xf32> to vector<1x128xf32>
    %cst_9 = arith.constant 6.250000e-02 : f32
    %18 = vector.broadcast %cst_9 : f32 to vector<1x128xf32>
    %19 = arith.mulf %17, %18 : vector<1x128xf32>
    %20 = vector.broadcast %19 : vector<1x128xf32> to vector<128x128xf32>
    %21 = arith.subf %9, %20 : vector<128x128xf32>
    %22 = arith.mulf %21, %14 : vector<128x128xf32>
    %23 = arith.mulf %22, %22 : vector<128x128xf32>
    %cst_10 = arith.constant dense<0.000000e+00> : vector<128xf32>
    %24 = vector.multi_reduction <add>, %23, %cst_10 [0] : vector<128x128xf32> to vector<128xf32>
    %25 = vector.shape_cast %24 : vector<128xf32> to vector<1x128xf32>
    %cst_11 = arith.constant 6.250000e-02 : f32
    %26 = vector.broadcast %cst_11 : f32 to vector<1x128xf32>
    %27 = arith.mulf %25, %26 : vector<1x128xf32>
    %cst_12 = arith.constant 9.99999974E-6 : f32
    %28 = vector.broadcast %cst_12 : f32 to vector<1x128xf32>
    %29 = arith.addf %27, %28 : vector<1x128xf32>
    %30 = math.rsqrt %29 : vector<1x128xf32>
    %31 = vector.broadcast %19 : vector<1x128xf32> to vector<128x128xf32>
    %32 = arith.subf %9, %31 : vector<128x128xf32>
    %33 = vector.broadcast %30 : vector<1x128xf32> to vector<128x128xf32>
    %34 = arith.mulf %32, %33 : vector<128x128xf32>
    %c0_13 = arith.constant 0 : index
    %c0_14 = arith.constant 0 : index
    %35 = vector.load %arg5[%c0_13, %c0_14] : memref<1x128xf32, #tpu.memory_space<vmem>>, vector<1x128xf32>
    %36 = vector.broadcast %35 : vector<1x128xf32> to vector<128x128xf32>
    %37 = arith.mulf %34, %36 : vector<128x128xf32>
    %c0_15 = arith.constant 0 : index
    %c0_16 = arith.constant 0 : index
    %38 = vector.load %arg6[%c0_15, %c0_16] : memref<1x128xf32, #tpu.memory_space<vmem>>, vector<1x128xf32>
    %39 = vector.broadcast %38 : vector<1x128xf32> to vector<128x128xf32>
    %40 = arith.addf %37, %39 : vector<128x128xf32>
    %41 = arith.truncf %40 : vector<128x128xf32> to vector<128x128xbf16>
    %c0_17 = arith.constant 0 : index
    %c0_18 = arith.constant 0 : index
    %42 = vector.load %arg7[%c0_17, %c0_18] : memref<128x128xbf16, #tpu.memory_space<vmem>>, vector<128x128xbf16>
    %cst_19 = arith.constant dense<0.000000e+00> : vector<128x128xf32>
    %43 = tpu.matmul %41, %42, %cst_19 {dimension_numbers = #tpu.dot_dimension_numbers<[1], [0], [0], [1], [0, 0, 1, 1], [], []>} : vector<128x128xbf16>, vector<128x128xbf16>, vector<128x128xf32> -> vector<128x128xf32>
    %44 = arith.truncf %43 : vector<128x128xf32> to vector<128x128xbf16>
    %cst_20 = arith.constant dense<0.000000e+00> : vector<128x128xf32>
    %45 = tpu.matmul %0, %44, %cst_20 {dimension_numbers = #tpu.dot_dimension_numbers<[1], [0], [0], [1], [0, 0, 1, 1], [], []>} : vector<128x128xbf16>, vector<128x128xbf16>, vector<128x128xf32> -> vector<128x128xf32>
    %c0_21 = arith.constant 0 : index
    %c0_22 = arith.constant 0 : index
    %46 = vector.load %arg8[%c0_21, %c0_22] : memref<1x128xf32, #tpu.memory_space<vmem>>, vector<1x128xf32>
    %47 = vector.broadcast %46 : vector<1x128xf32> to vector<128x128xf32>
    %48 = arith.addf %45, %47 : vector<128x128xf32>
    %49 = tpu.iota {dimensions = array<i32: 0>} : vector<128x128xi32>
    %c16_i32_23 = arith.constant 16 : i32
    %50 = vector.broadcast %c16_i32_23 : i32 to vector<128x128xi32>
    %51 = arith.cmpi slt, %49, %50 : vector<128x128xi32>
    %52 = arith.extui %51 : vector<128x128xi1> to vector<128x128xi32>
    %53 = arith.sitofp %52 : vector<128x128xi32> to vector<128x128xf32>
    %54 = arith.mulf %48, %53 : vector<128x128xf32>
    %cst_24 = arith.constant dense<0.000000e+00> : vector<128xf32>
    %55 = vector.multi_reduction <add>, %54, %cst_24 [0] : vector<128x128xf32> to vector<128xf32>
    %56 = vector.shape_cast %55 : vector<128xf32> to vector<1x128xf32>
    %cst_25 = arith.constant 6.250000e-02 : f32
    %57 = vector.broadcast %cst_25 : f32 to vector<1x128xf32>
    %58 = arith.mulf %56, %57 : vector<1x128xf32>
    %59 = vector.broadcast %58 : vector<1x128xf32> to vector<128x128xf32>
    %60 = arith.subf %48, %59 : vector<128x128xf32>
    %61 = arith.mulf %60, %53 : vector<128x128xf32>
    %62 = arith.mulf %61, %61 : vector<128x128xf32>
    %cst_26 = arith.constant dense<0.000000e+00> : vector<128xf32>
    %63 = vector.multi_reduction <add>, %62, %cst_26 [0] : vector<128x128xf32> to vector<128xf32>
    %64 = vector.shape_cast %63 : vector<128xf32> to vector<1x128xf32>
    %cst_27 = arith.constant 6.250000e-02 : f32
    %65 = vector.broadcast %cst_27 : f32 to vector<1x128xf32>
    %66 = arith.mulf %64, %65 : vector<1x128xf32>
    %cst_28 = arith.constant 9.99999974E-6 : f32
    %67 = vector.broadcast %cst_28 : f32 to vector<1x128xf32>
    %68 = arith.addf %66, %67 : vector<1x128xf32>
    %69 = math.rsqrt %68 : vector<1x128xf32>
    %70 = vector.broadcast %58 : vector<1x128xf32> to vector<128x128xf32>
    %71 = arith.subf %48, %70 : vector<128x128xf32>
    %72 = vector.broadcast %69 : vector<1x128xf32> to vector<128x128xf32>
    %73 = arith.mulf %71, %72 : vector<128x128xf32>
    %c0_29 = arith.constant 0 : index
    %c0_30 = arith.constant 0 : index
    %74 = vector.load %arg9[%c0_29, %c0_30] : memref<1x128xf32, #tpu.memory_space<vmem>>, vector<1x128xf32>
    %75 = vector.broadcast %74 : vector<1x128xf32> to vector<128x128xf32>
    %76 = arith.mulf %73, %75 : vector<128x128xf32>
    %c0_31 = arith.constant 0 : index
    %c0_32 = arith.constant 0 : index
    %77 = vector.load %arg10[%c0_31, %c0_32] : memref<1x128xf32, #tpu.memory_space<vmem>>, vector<1x128xf32>
    %78 = vector.broadcast %77 : vector<1x128xf32> to vector<128x128xf32>
    %79 = arith.addf %76, %78 : vector<128x128xf32>
    %80 = arith.truncf %79 : vector<128x128xf32> to vector<128x128xbf16>
    %c0_33 = arith.constant 0 : index
    %c0_34 = arith.constant 0 : index
    %81 = vector.load %arg11[%c0_33, %c0_34] : memref<128x128xbf16, #tpu.memory_space<vmem>>, vector<128x128xbf16>
    %cst_35 = arith.constant dense<0.000000e+00> : vector<128x128xf32>
    %82 = tpu.matmul %80, %81, %cst_35 {dimension_numbers = #tpu.dot_dimension_numbers<[1], [0], [0], [1], [0, 0, 1, 1], [], []>} : vector<128x128xbf16>, vector<128x128xbf16>, vector<128x128xf32> -> vector<128x128xf32>
    %83 = arith.truncf %82 : vector<128x128xf32> to vector<128x128xbf16>
    %cst_36 = arith.constant dense<0.000000e+00> : vector<128x128xf32>
    %84 = tpu.matmul %0, %83, %cst_36 {dimension_numbers = #tpu.dot_dimension_numbers<[1], [0], [0], [1], [0, 0, 1, 1], [], []>} : vector<128x128xbf16>, vector<128x128xbf16>, vector<128x128xf32> -> vector<128x128xf32>
    %c0_37 = arith.constant 0 : index
    %c0_38 = arith.constant 0 : index
    %85 = vector.load %arg12[%c0_37, %c0_38] : memref<1x128xf32, #tpu.memory_space<vmem>>, vector<1x128xf32>
    %86 = vector.broadcast %85 : vector<1x128xf32> to vector<128x128xf32>
    %87 = arith.addf %84, %86 : vector<128x128xf32>
    %c0_39 = arith.constant 0 : index
    %c0_40 = arith.constant 0 : index
    %88 = vector.load %arg13[%c0_39, %c0_40] : memref<128x128xf32, #tpu.memory_space<vmem>>, vector<128x128xf32>
    tpu.vector_store %arg13[%c0_39, %c0_40], %87 {strides = array<i32>} : memref<128x128xf32, #tpu.memory_space<vmem>>, vector<128x128xf32>,
    return
  }
  func.func @transform_0(%arg0: i32) -> (i32, i32) {
    %c0_i32 = arith.constant 0 : i32
    %c0_i32_0 = arith.constant 0 : i32
    %c0_i32_1 = arith.constant 0 : i32
    return %c0_i32, %c0_i32_0 : i32, i32
  }
  func.func @transform_1(%arg0: i32) -> (i32, i32) {
    %c0_i32 = arith.constant 0 : i32
    %c0_i32_0 = arith.constant 0 : i32
    %c0_i32_1 = arith.constant 0 : i32
    return %c0_i32, %c0_i32_0 : i32, i32
  }
  func.func @transform_2(%arg0: i32) -> (i32, i32) {
    %c0_i32 = arith.constant 0 : i32
    %c0_i32_0 = arith.constant 0 : i32
    %c0_i32_1 = arith.constant 0 : i32
    return %c0_i32, %c0_i32_0 : i32, i32
  }
  func.func @transform_3(%arg0: i32) -> (i32, i32) {
    %c0_i32 = arith.constant 0 : i32
    %c0_i32_0 = arith.constant 0 : i32
    %c0_i32_1 = arith.constant 0 : i32
    return %c0_i32, %c0_i32_0 : i32, i32
  }
  func.func @transform_4(%arg0: i32) -> (i32, i32) {
    %c0_i32 = arith.constant 0 : i32
    %c0_i32_0 = arith.constant 0 : i32
    %c0_i32_1 = arith.constant 0 : i32
    return %c0_i32, %c0_i32_0 : i32, i32
  }
  func.func @transform_5(%arg0: i32) -> (i32, i32) {
    %c0_i32 = arith.constant 0 : i32
    %c0_i32_0 = arith.constant 0 : i32
    %c0_i32_1 = arith.constant 0 : i32
    return %c0_i32, %c0_i32_0 : i32, i32
  }
  func.func @transform_6(%arg0: i32) -> (i32, i32) {
    %c0_i32 = arith.constant 0 : i32
    %c0_i32_0 = arith.constant 0 : i32
    %c0_i32_1 = arith.constant 0 : i32
    return %c0_i32, %c0_i32_0 : i32, i32
  }
  func.func @transform_7(%arg0: i32) -> (i32, i32) {
    %c0_i32 = arith.constant 0 : i32
    %c0_i32_0 = arith.constant 0 : i32
    %c0_i32_1 = arith.constant 0 : i32
    return %c0_i32, %c0_i32_0 : i32, i32
  }
  func.func @transform_8(%arg0: i32) -> (i32, i32) {
    %c0_i32 = arith.constant 0 : i32
    %c0_i32_0 = arith.constant 0 : i32
    %c0_i32_1 = arith.constant 0 : i32
    return %c0_i32, %c0_i32_0 : i32, i32
  }
  func.func @transform_9(%arg0: i32) -> (i32, i32) {
    %c0_i32 = arith.constant 0 : i32
    %c0_i32_0 = arith.constant 0 : i32
    %c0_i32_1 = arith.constant 0 : i32
    return %c0_i32, %c0_i32_0 : i32, i32
  }
  func.func @transform_10(%arg0: i32) -> (i32, i32) {
    %c0_i32 = arith.constant 0 : i32
    %c0_i32_0 = arith.constant 0 : i32
    %c0_i32_1 = arith.constant 0 : i32
    return %c0_i32, %c0_i32_0 : i32, i32
  }
  func.func @transform_11(%arg0: i32) -> (i32, i32) {
    %c0_i32 = arith.constant 0 : i32
    %c0_i32_0 = arith.constant 0 : i32
    %c0_i32_1 = arith.constant 0 : i32
    return %c0_i32, %c0_i32_0 : i32, i32
  }
  func.func @transform_12(%arg0: i32) -> (i32, i32) {
    %c0_i32 = arith.constant 0 : i32
    %c0_i32_0 = arith.constant 0 : i32
    %c0_i32_1 = arith.constant 0 : i32
    return %c0_i32, %c0_i32_0 : i32, i32
  }
}

</mosaic_0001>

<bundles_post_ra>
// kernel: tpu_custom_call.1
= control target key start
LH: loop header
LB: loop body
LE: loop exit
PB: predicated region body
PF: predicated region fallthrough
CT: control target
= control target key end

     0   :  { %17 = vsyncpa [#allocation3], 0  ;;  %s2365_s0 = inlined_call_operand.hbm [shape: bf16[128,128], index: 0, kind: input, shape index: {}]   ;;  %s2366_s1 = inlined_call_operand.hbm [shape: f32[128,128], index: 1, kind: input, shape index: {}]   ;;  %s2367_s2 = inlined_call_operand.hbm [shape: bf16[128,128], index: 2, kind: input, shape index: {}]   ;;  %s2368_s3 = inlined_call_operand.vmem [shape: f32[1,128], index: 3, kind: input, shape index: {}]   ;;  %s2369_s4 = inlined_call_operand.vmem [shape: f32[1,128], index: 4, kind: input, shape index: {}]   ;;  %s2370_s5 = inlined_call_operand.vmem [shape: f32[1,128], index: 5, kind: input, shape index: {}]   ;;  %s2371_s6 = inlined_call_operand.hbm [shape: bf16[128,128], index: 6, kind: input, shape index: {}]   ;;  %s2372_s7 = inlined_call_operand.vmem [shape: f32[1,128], index: 7, kind: input, shape index: {}]   ;;  %s2373_s8 = inlined_call_operand.vmem [shape: f32[1,128], index: 8, kind: input, shape index: {}]   ;;  %s2374_s9 = inlined_call_operand.vmem [shape: f32[1,128], index: 9, kind: input, shape index: {}]   ;;  %s2375_s10 = inlined_call_operand.hbm [shape: bf16[128,128], index: 10, kind: input, shape index: {}]   ;;  %s2376_s11 = inlined_call_operand.vmem [shape: f32[1,128], index: 11, kind: input, shape index: {}]   ;;  %s2377_s12 = inlined_call_operand.hbm [shape: f32[128,128], index: 12, kind: output, shape index: {}]  }
   0x1   :  { %18 = vsyncpa [#allocation6], 0 }
   0x2   :  { %19 = vsyncpa [#allocation9], 0 }
   0x3   :  { %20 = vsyncpa [#allocation4], 0  ;;  %s1998_s21 = smov [#allocation5]   ;;  %s1858_s25 = scalar_lea.hbm %s2366_s1, 2048 }
   0x4   :  { %s38_s22 = sshll.u32 %s1998_s21, 4  ;;  %p1859_p0 = scmp.ne.s32.totalorder %s2366_s1, %s1858_s25  ;;  %s39_s22 = int_to_ptr.vmem [resolvable:$true] %s38_s22 }
   0x5   :  { %p1862_p1 = scmp.lt.u32.totalorder %s1858_s25, %s2366_s1 }
   0x7   :  { %p1864_p2 = pnand %p1862_p1, %p1859_p0 }
   0x9   :  { %1867 = shalt.err (!%p1864_p2)
}
   0xa   :  { %s1868_s30 = scalar_lea.vmem %s39_s22, 2048  ;;  %p1873_p4 = scmp.lt.s32.totalorder %s39_s22, %s39_s22 }
   0xb   :  { %p1869_p3 = scmp.ne.s32.totalorder %s39_s22, %s1868_s30  ;;  %p1874_p5 = scmp.lt.s32.totalorder %s1868_s30, %s1868_s30 }
   0xd   :  { %p1875_p6 = por %p1874_p5, %p1873_p4 }
   0xf   :  { %p1876_p7 = pnand %p1875_p6, %p1869_p3 }
  0x11   :  { %1879 = shalt.err (!%p1876_p7)
}
  0x12   :  { %s1999_s13 = smov 128   ;;  %s2000_s14 = smov 8  }
  0x13   :  { %44 = dma.hbm_to_vmem [thread:$0]  %s2366_s1, 2048, %s39_s22, [#allocation6], %s1999_s13, %s1999_s13, %s2000_s14  }
  0x14   :  { %s2001_s17 = smov [#allocation8]   ;;  %s2002_s19 = smov [#allocation2]  }
  0x15   :  { %s68_s18 = sshll.u32 %s2001_s17, 4  ;;  %s26_s20 = sshll.u32 %s2002_s19, 4  ;;  %s69_s18 = int_to_ptr.vmem [resolvable:$true] %s68_s18  ;;  %s27_s20 = int_to_ptr.vmem [resolvable:$true] %s26_s20 }
  0x16   :  { %s1880_s24 = scalar_lea.hbm %s2371_s6, 1024 }
  0x17   :  { %p1881_p8 = scmp.ne.s32.totalorder %s2371_s6, %s1880_s24  ;;  %p1884_p9 = scmp.lt.u32.totalorder %s1880_s24, %s2371_s6 }
  0x19   :  { %p1886_p10 = pnand %p1884_p9, %p1881_p8 }
  0x1b   :  { %1889 = shalt.err (!%p1886_p10)
}
  0x1c   :  { %s1890_s1 = scalar_lea.vmem %s69_s18, 1024  ;;  %p1895_p12 = scmp.lt.s32.totalorder %s69_s18, %s69_s18 }
  0x1d   :  { %p1891_p11 = scmp.ne.s32.totalorder %s69_s18, %s1890_s1  ;;  %p1896_p13 = scmp.lt.s32.totalorder %s1890_s1, %s1890_s1 }
  0x1f   :  { %p1897_p0 = por %p1896_p13, %p1895_p12 }
  0x21   :  { %p1898_p1 = pnand %p1897_p0, %p1891_p11 }
  0x23   :  { %1901 = shalt.err (!%p1898_p1)
}
  0x24   :  { %s2003_s22 = smov 64   ;;  %s2004_s29 = smov 4  }
  0x25   :  { %74 = dma.hbm_to_vmem [thread:$0]  %s2371_s6, 1024, %s69_s18, [#allocation9], %s2003_s22, %s2003_s22, %s2004_s29  }
  0x26   :  { %s1902_s19 = scalar_lea.hbm %s2365_s0, 1024 }
  0x27   :  { %p1903_p2 = scmp.ne.s32.totalorder %s2365_s0, %s1902_s19  ;;  %p1906_p3 = scmp.lt.u32.totalorder %s1902_s19, %s2365_s0 }
  0x29   :  { %p1908_p4 = pnand %p1906_p3, %p1903_p2 }
  0x2b   :  { %1911 = shalt.err (!%p1908_p4)
}
  0x2c   :  { %s1912_s26 = scalar_lea.vmem %s27_s20, 1024  ;;  %p1917_p6 = scmp.lt.s32.totalorder %s27_s20, %s27_s20 }
  0x2d   :  { %p1913_p5 = scmp.ne.s32.totalorder %s27_s20, %s1912_s26  ;;  %p1918_p7 = scmp.lt.s32.totalorder %s1912_s26, %s1912_s26 }
  0x2f   :  { %p1919_p8 = por %p1918_p7, %p1917_p6 }
  0x31   :  { %p1920_p9 = pnand %p1919_p8, %p1913_p5 }
  0x33   :  { %1923 = shalt.err (!%p1920_p9)
}
  0x34   :  { %32 = dma.hbm_to_vmem [thread:$0]  %s2365_s0, 1024, %s27_s20, [#allocation3], %s2003_s22, %s2003_s22, %s2004_s29  }
  0x35   :  { %s2005_s27 = smov [#allocation7]   ;;  %s2006_s1 = smov [#allocation10]  }
  0x36   :  { %s50_s28 = sshll.u32 %s2005_s27, 4  ;;  %s86_s30 = sshll.u32 %s2006_s1, 4  ;;  %s51_s28 = int_to_ptr.vmem [resolvable:$true] %s50_s28  ;;  %s87_s30 = int_to_ptr.vmem [resolvable:$true] %s86_s30 }
  0x37   :  { %s1924_s17 = scalar_lea.hbm %s2367_s2, 1024 }
  0x38   :  { %p1925_p10 = scmp.ne.s32.totalorder %s2367_s2, %s1924_s17  ;;  %p1928_p11 = scmp.lt.u32.totalorder %s1924_s17, %s2367_s2 }
  0x3a   :  { %p1930_p12 = pnand %p1928_p11, %p1925_p10 }
  0x3c   :  { %1933 = shalt.err (!%p1930_p12)
}
  0x3d   :  { %s1934_s0 = scalar_lea.vmem %s51_s28, 1024  ;;  %p1939_p0 = scmp.lt.s32.totalorder %s51_s28, %s51_s28 }
  0x3e   :  { %p1935_p13 = scmp.ne.s32.totalorder %s51_s28, %s1934_s0  ;;  %p1940_p1 = scmp.lt.s32.totalorder %s1934_s0, %s1934_s0 }
  0x40   :  { %p1941_p2 = por %p1940_p1, %p1939_p0 }
  0x42   :  { %p1942_p3 = pnand %p1941_p2, %p1935_p13 }
  0x44   :  { %1945 = shalt.err (!%p1942_p3)
}
  0x45   :  { %56 = dma.hbm_to_vmem [thread:$0]  %s2367_s2, 1024, %s51_s28, [#allocation6], %s2003_s22, %s2003_s22, %s2004_s29  }
  0x46   :  { %s1946_s18 = scalar_lea.hbm %s2375_s10, 1024 }
  0x47   :  { %p1947_p4 = scmp.ne.s32.totalorder %s2375_s10, %s1946_s18  ;;  %p1950_p5 = scmp.lt.u32.totalorder %s1946_s18, %s2375_s10 }
  0x49   :  { %p1952_p6 = pnand %p1950_p5, %p1947_p4 }
  0x4b   :  { %1955 = shalt.err (!%p1952_p6)
}
  0x4c   :  { %s1956_s17 = scalar_lea.vmem %s87_s30, 1024  ;;  %p1961_p8 = scmp.lt.s32.totalorder %s87_s30, %s87_s30 }
  0x4d   :  { %p1957_p7 = scmp.ne.s32.totalorder %s87_s30, %s1956_s17  ;;  %p1962_p9 = scmp.lt.s32.totalorder %s1956_s17, %s1956_s17 }
  0x4f   :  { %p1963_p10 = por %p1962_p9, %p1961_p8 }
  0x51   :  { %p1964_p11 = pnand %p1963_p10, %p1957_p7 }
  0x53   :  { %1967 = shalt.err (!%p1964_p11)
}
  0x54   :  { %92 = dma.hbm_to_vmem [thread:$0]  %s2375_s10, 1024, %s87_s30, [#allocation9], %s2003_s22, %s2003_s22, %s2004_s29  }
  0x55   :  { %1990 = dma.done.wait [#allocation3], 1024  }
  0x56   :  { %1991 = vsyncadd [#allocation3], 4294966272 }
  0x57   :  { %1992 = dma.done.wait [#allocation6], 3072  }
  0x58   :  { %1993 = vsyncadd [#allocation6], 4294964224 }
  0x59   :  { %1994 = dma.done.wait [#allocation9], 2048  }
  0x5a   :  { %1995 = vsyncadd [#allocation9], 4294965248  ;;  %v1815_v0 = vld [vmem:[#allocation7] sm:$0xff]   ;;  %v1816_v1 = vld [vmem:[#allocation7 + $0x8] sm:$0xff]  }
  0x5b   :  { %1613 = vmatprep.subr.bf16.mxu0 %v1815_v0  ;;  %v1817_v2 = vld [vmem:[#allocation7 + $0x10] sm:$0xff]   ;;  %v1818_v3 = vld [vmem:[#allocation7 + $0x18] sm:$0xff]   ;;  %v127_v4 = vld [vmem:[#allocation5] sm:$0xff] }
  0x5c   :  { %1614 = vmatpush3.bf16.msra.mxu0 %v1815_v0  ;;  %v128_v5 = vld [vmem:[#allocation5 + $0x8] sm:$0xff]  ;;  %v1819_v7 = vld [vmem:[#allocation7 + $0x20] sm:$0xff]   ;;  %v1821_v9 = vld [vmem:[#allocation7 + $0x30] sm:$0xff]  }
  0x5d   :  { %1615 = vmatprep.subr.bf16.mxu0 %v1816_v1  ;;  %v143_v6 = vpack.c.bf16 %v128_v5, %v127_v4  ;;  %v1820_v8 = vld [vmem:[#allocation7 + $0x28] sm:$0xff]   ;;  %v1822_v10 = vld [vmem:[#allocation7 + $0x38] sm:$0xff]   ;;  %v129_v11 = vld [vmem:[#allocation5 + $0x10] sm:$0xff] }
  0x5e   :  { %v130_v12 = vld [vmem:[#allocation5 + $0x18] sm:$0xff]  ;;  %v131_v13 = vld [vmem:[#allocation5 + $0x20] sm:$0xff]  ;;  %v132_v14 = vld [vmem:[#allocation5 + $0x28] sm:$0xff] }
  0x5f   :  { %1629 = vmatprep.mubr.bf16.mxu0 %v143_v6  ;;  %v144_v15 = vpack.c.bf16 %v130_v12, %v129_v11  ;;  %v145_v16 = vpack.c.bf16 %v132_v14, %v131_v13  ;;  %v133_v17 = vld [vmem:[#allocation5 + $0x30] sm:$0xff]  ;;  %v134_v18 = vld [vmem:[#allocation5 + $0x38] sm:$0xff]  ;;  %v135_v19 = vld [vmem:[#allocation5 + $0x40] sm:$0xff] }
  0x60   :  { %1616 = vmatpush3.bf16.msra.mxu0 %v1816_v1  ;;  %v136_v20 = vld [vmem:[#allocation5 + $0x48] sm:$0xff]  ;;  %v146_v21 = vpack.c.bf16 %v134_v18, %v133_v17  ;;  %v137_v23 = vld [vmem:[#allocation5 + $0x50] sm:$0xff]  ;;  %v138_v24 = vld [vmem:[#allocation5 + $0x58] sm:$0xff] }
  0x61   :  { %1617 = vmatprep.subr.bf16.mxu0 %v1817_v2  ;;  %v147_v22 = vpack.c.bf16 %v136_v20, %v135_v19  ;;  %v139_v25 = vld [vmem:[#allocation5 + $0x60] sm:$0xff]  ;;  %v140_v26 = vld [vmem:[#allocation5 + $0x68] sm:$0xff]  ;;  %v148_v27 = vpack.c.bf16 %v138_v24, %v137_v23  ;;  %v141_v29 = vld [vmem:[#allocation5 + $0x70] sm:$0xff] }
  0x62   :  { %v149_v28 = vpack.c.bf16 %v140_v26, %v139_v25  ;;  %v142_v30 = vld [vmem:[#allocation5 + $0x78] sm:$0xff]  ;;  %v2148_v32 = vld [vmem:[#allocation2] sm:$0xff]   ;;  %v2151_v57 = vld [vmem:[#allocation2 + $0x8] sm:$0xff]  }
  0x63   :  { %v150_v31 = vpack.c.bf16 %v142_v30, %v141_v29  ;;  %1661 = vmatprep.mubr.bf16.mxu1 %v2148_v32  ;;  %v2153_v58 = vld [vmem:[#allocation2 + $0x10] sm:$0xff]   ;;  %v2157_v59 = vld [vmem:[#allocation2 + $0x18] sm:$0xff]   ;;  %v2159_v60 = vld [vmem:[#allocation2 + $0x20] sm:$0xff]  }
  0x64   :  { %1618 = vmatpush3.bf16.msra.mxu0 %v1817_v2  ;;  %v2163_v61 = vld [vmem:[#allocation2 + $0x28] sm:$0xff]   ;;  %v2165_v62 = vld [vmem:[#allocation2 + $0x30] sm:$0xff]   ;;  %v2169_v63 = vld [vmem:[#allocation2 + $0x38] sm:$0xff]  }
  0x65   :  { %1619 = vmatprep.subr.bf16.mxu0 %v1818_v3  ;;  %v1831_v0 = vld [vmem:[#allocation8] sm:$0xff]   ;;  %v1832_v1 = vld [vmem:[#allocation8 + $0x8] sm:$0xff]   ;;  %v1833_v2 = vld [vmem:[#allocation8 + $0x10] sm:$0xff]  }
  0x66   :  { %v1835_v4 = vld [vmem:[#allocation8 + $0x20] sm:$0xff]   ;;  %v1836_v5 = vld [vmem:[#allocation8 + $0x28] sm:$0xff]   ;;  %v1837_v6 = vld [vmem:[#allocation8 + $0x30] sm:$0xff]  }
  0x68   :  { %1620 = vmatpush3.bf16.msra.mxu0 %v1818_v3  ;;  %v1834_v3 = vld [vmem:[#allocation8 + $0x18] sm:$0xff]  }
  0x69   :  { %1621 = vmatprep.subr.bf16.mxu0 %v1819_v7 }
  0x6c   :  { %1622 = vmatpush3.bf16.msra.mxu0 %v1819_v7  ;;  %v1838_v7 = vld [vmem:[#allocation8 + $0x38] sm:$0xff]  }
  0x6d   :  { %1623 = vmatprep.subr.bf16.mxu0 %v1820_v8 }
  0x70   :  { %1624 = vmatpush3.bf16.msra.mxu0 %v1820_v8  ;;  %v1486_v8 = vld [vmem:[%s2368_s3] ss:$0 sm:$0xff] }
  0x71   :  { %1625 = vmatprep.subr.bf16.mxu0 %v1821_v9 }
  0x74   :  { %1626 = vmatpush3.bf16.msra.mxu0 %v1821_v9 }
  0x75   :  { %1627 = vmatprep.subr.bf16.mxu0 %v1822_v10 }
  0x78   :  { %1628 = vmatpush3.bf16.msra.mxu0 %v1822_v10 }
  0x79   :  { %1677 = vmatprep.subr.bf16.mxu0 %v1831_v0 }
  0x7b   :  { %1630 = vmatmul.mubr.bf16.vlgmr.msra.gmra.mrb[0].mxu0 %v144_v15 }
  0x7c   :  { %1633 = vmatprep.mubr.bf16.mxu0 %v145_v16  ;;  %1678 = vmatpush3.bf16.msra.mxu0 %v1831_v0 }
  0x7d   :  { %1679 = vmatprep.subr.bf16.mxu0 %v1832_v1 }
  0x80   :  { %1680 = vmatpush3.bf16.msra.mxu0 %v1832_v1 }
  0x81   :  { %1681 = vmatprep.subr.bf16.mxu0 %v1833_v2 }
  0x83   :  { %1634 = vmatmul.mubr.bf16.gmra.mrb[4].mxu0 %v146_v21 }
  0x84   :  { %1637 = vmatprep.mubr.bf16.mxu0 %v147_v22  ;;  %1682 = vmatpush3.bf16.msra.mxu0 %v1833_v2 }
  0x85   :  { %1683 = vmatprep.subr.bf16.mxu0 %v1834_v3 }
  0x88   :  { %1684 = vmatpush3.bf16.msra.mxu0 %v1834_v3 }
  0x89   :  { %1685 = vmatprep.subr.bf16.mxu0 %v1835_v4 }
  0x8b   :  { %1638 = vmatmul.mubr.bf16.gmra.mrb[8].mxu0 %v148_v27 }
  0x8c   :  { %1641 = vmatprep.mubr.bf16.mxu0 %v149_v28  ;;  %1686 = vmatpush3.bf16.msra.mxu0 %v1835_v4 }
  0x8d   :  { %1687 = vmatprep.subr.bf16.mxu0 %v1836_v5 }
  0x90   :  { %1688 = vmatpush3.bf16.msra.mxu0 %v1836_v5 }
  0x91   :  { %1689 = vmatprep.subr.bf16.mxu0 %v1837_v6 }
  0x93   :  { %1642 = vmatmul.mubr.bf16.gmra.mrb[12].mxu0 %v150_v31 }
  0x94   :  { %1690 = vmatpush3.bf16.msra.mxu0 %v1837_v6 }
  0x95   :  { %1691 = vmatprep.subr.bf16.mxu0 %v1838_v7 }
  0x98   :  { %1692 = vmatpush3.bf16.msra.mxu0 %v1838_v7 }
 0x14e   :  { %v1631_v33 = vpop.f32.mrb[0].mxu0 }
 0x14f   :  { %v249_v34 = vpop.f32.mrb[1].mxu0 }
 0x150   :  { %v1632_v35 = vpop.f32.mrb[2].mxu0 }
 0x151   :  { %v313_v36 = vpack.c.bf16 %v1632_v35, %v1631_v33  ;;  %v252_v37 = vpop.f32.mrb[3].mxu0 }
 0x152   :  { %v312_v38 = vpack.c.bf16 %v252_v37, %v249_v34 }
 0x154   :  { %1645 = vmatprep.subr.bf16.mxu1 %v312_v38 }
 0x155   :  { %1646 = vmatpush3.bf16.msra.mxu1 %v312_v38 }
 0x156   :  { %v1635_v39 = vpop.f32.mrb[4].mxu0  ;;  %1647 = vmatprep.subr.bf16.mxu1 %v313_v36 }
 0x157   :  { %v265_v40 = vpop.f32.mrb[5].mxu0 }
 0x158   :  { %v1636_v41 = vpop.f32.mrb[6].mxu0 }
 0x159   :  { %v315_v42 = vpack.c.bf16 %v1636_v41, %v1635_v39  ;;  %v268_v43 = vpop.f32.mrb[7].mxu0  ;;  %1648 = vmatpush3.bf16.msra.mxu1 %v313_v36 }
 0x15a   :  { %v314_v44 = vpack.c.bf16 %v268_v43, %v265_v40 }
 0x15c   :  { %1649 = vmatprep.subr.bf16.mxu1 %v314_v44 }
 0x15d   :  { %1650 = vmatpush3.bf16.msra.mxu1 %v314_v44 }
 0x15e   :  { %v1639_v45 = vpop.f32.mrb[8].mxu0  ;;  %1651 = vmatprep.subr.bf16.mxu1 %v315_v42 }
 0x15f   :  { %v281_v46 = vpop.f32.mrb[9].mxu0 }
 0x160   :  { %v1640_v47 = vpop.f32.mrb[10].mxu0 }
 0x161   :  { %v317_v48 = vpack.c.bf16 %v1640_v47, %v1639_v45  ;;  %v284_v49 = vpop.f32.mrb[11].mxu0  ;;  %1652 = vmatpush3.bf16.msra.mxu1 %v315_v42 }
 0x162   :  { %v316_v50 = vpack.c.bf16 %v284_v49, %v281_v46 }
 0x164   :  { %1653 = vmatprep.subr.bf16.mxu1 %v316_v50 }
 0x165   :  { %1654 = vmatpush3.bf16.msra.mxu1 %v316_v50 }
 0x166   :  { %v1643_v51 = vpop.f32.mrb[12].mxu0  ;;  %1655 = vmatprep.subr.bf16.mxu1 %v317_v48 }
 0x167   :  { %v297_v52 = vpop.f32.mrb[13].mxu0 }
 0x168   :  { %v1644_v53 = vpop.f32.mrb[14].mxu0 }
 0x169   :  { %v319_v54 = vpack.c.bf16 %v1644_v53, %v1643_v51  ;;  %v300_v55 = vpop.f32.mrb[15].mxu0  ;;  %1656 = vmatpush3.bf16.msra.mxu1 %v317_v48 }
 0x16a   :  { %v318_v56 = vpack.c.bf16 %v300_v55, %v297_v52 }
 0x16c   :  { %1657 = vmatprep.subr.bf16.mxu1 %v318_v56 }
 0x16d   :  { %1658 = vmatpush3.bf16.msra.mxu1 %v318_v56 }
 0x16e   :  { %1659 = vmatprep.subr.bf16.mxu1 %v319_v54 }
 0x171   :  { %1660 = vmatpush3.bf16.msra.mxu1 %v319_v54 }
 0x174   :  { %1662 = vmatmul.mubr.bf16.vlgmr.msra.gmra.mrb[0].mxu1 %v2151_v57 }
 0x175   :  { %1665 = vmatprep.mubr.bf16.mxu1 %v2153_v58 }
 0x17c   :  { %1666 = vmatmul.mubr.bf16.gmra.mrb[4].mxu1 %v2157_v59 }
 0x17d   :  { %1669 = vmatprep.mubr.bf16.mxu1 %v2159_v60 }
 0x184   :  { %1670 = vmatmul.mubr.bf16.gmra.mrb[8].mxu1 %v2163_v61 }
 0x185   :  { %1673 = vmatprep.mubr.bf16.mxu1 %v2165_v62 }
 0x18c   :  { %1674 = vmatmul.mubr.bf16.gmra.mrb[12].mxu1 %v2169_v63 }
 0x18d   :  { %1725 = vmatprep.mubr.bf16.mxu1 %v2148_v32 }
 0x247   :  { %v1663_v9 = vpop.f32.mrb[0].mxu1 }
 0x248   :  { %v409_v10 = vpop.f32.mrb[1].mxu1  ;;  %v2176_v11 = vadd.f32 %v1663_v9, %v1486_v8 }
 0x249   :  { %v1664_v12 = vpop.f32.mrb[2].mxu1  ;;  %v2178_v14 = vadd.f32 %v1486_v8, %v409_v10 }
 0x24a   :  { %v412_v13 = vpop.f32.mrb[3].mxu1  ;;  %v2180_v15 = vadd.f32 %v1664_v12, %v1486_v8  ;;  %v539_v17 = vmul.f32 0.0, %v2176_v11 }
 0x24b   :  { %v413_v16 = vadd.f32 %v1486_v8, %v412_v13 }
 0x24c   :  { %v540_v19 = vmul.f32 0.0, %v2180_v15 }
 0x24d   :  { %v553_v18 = vadd.f32 %v413_v16, %v2178_v14 }
 0x24f   :  { %v554_v20 = vadd.f32 %v553_v18, %v539_v17  ;;  %v1667_v21 = vpop.f32.mrb[4].mxu1 }
 0x250   :  { %v425_v22 = vpop.f32.mrb[5].mxu1  ;;  %v434_v27 = vadd.f32 %v1667_v21, %v1486_v8 }
 0x251   :  { %v426_v23 = vadd.f32 %v1486_v8, %v425_v22  ;;  %v555_v24 = vadd.f32 %v554_v20, %v540_v19  ;;  %v1668_v25 = vpop.f32.mrb[6].mxu1 }
 0x252   :  { %v428_v26 = vpop.f32.mrb[7].mxu1  ;;  %v437_v31 = vadd.f32 %v1668_v25, %v1486_v8  ;;  %v543_v34 = vmul.f32 0.0, %v434_v27 }
 0x253   :  { %v541_v28 = vmul.f32 0.0, %v426_v23  ;;  %v429_v29 = vadd.f32 %v1486_v8, %v428_v26 }
 0x254   :  { %v544_v38 = vmul.f32 0.0, %v437_v31 }
 0x255   :  { %v556_v30 = vadd.f32 %v555_v24, %v541_v28  ;;  %v542_v33 = vmul.f32 0.0, %v429_v29 }
 0x257   :  { %v557_v35 = vadd.f32 %v556_v30, %v542_v33  ;;  %v1671_v36 = vpop.f32.mrb[8].mxu1 }
 0x258   :  { %v441_v37 = vpop.f32.mrb[9].mxu1  ;;  %v450_v43 = vadd.f32 %v1671_v36, %v1486_v8 }
 0x259   :  { %v558_v39 = vadd.f32 %v557_v35, %v543_v34  ;;  %v442_v40 = vadd.f32 %v1486_v8, %v441_v37  ;;  %v1672_v41 = vpop.f32.mrb[10].mxu1 }
 0x25a   :  { %v444_v42 = vpop.f32.mrb[11].mxu1  ;;  %v453_v48 = vadd.f32 %v1672_v41, %v1486_v8  ;;  %v547_v50 = vmul.f32 0.0, %v450_v43 }
 0x25b   :  { %v545_v44 = vmul.f32 0.0, %v442_v40  ;;  %v559_v45 = vadd.f32 %v558_v39, %v544_v38  ;;  %v445_v46 = vadd.f32 %v1486_v8, %v444_v42 }
 0x25c   :  { %v548_v54 = vmul.f32 0.0, %v453_v48 }
 0x25d   :  { %v560_v47 = vadd.f32 %v559_v45, %v545_v44  ;;  %v546_v49 = vmul.f32 0.0, %v445_v46 }
 0x25f   :  { %v561_v51 = vadd.f32 %v560_v47, %v546_v49  ;;  %v1675_v52 = vpop.f32.mrb[12].mxu1 }
 0x260   :  { %v457_v53 = vpop.f32.mrb[13].mxu1  ;;  %v466_v2 = vadd.f32 %v1675_v52, %v1486_v8 }
 0x261   :  { %v562_v55 = vadd.f32 %v561_v51, %v547_v50  ;;  %v458_v56 = vadd.f32 %v1486_v8, %v457_v53  ;;  %v1676_v0 = vpop.f32.mrb[14].mxu1 }
 0x262   :  { %v460_v1 = vpop.f32.mrb[15].mxu1  ;;  %v469_v7 = vadd.f32 %v1676_v0, %v1486_v8  ;;  %v551_v10 = vmul.f32 0.0, %v466_v2 }
 0x263   :  { %v549_v3 = vmul.f32 0.0, %v458_v56  ;;  %v563_v4 = vadd.f32 %v562_v55, %v548_v54  ;;  %v461_v5 = vadd.f32 %v1486_v8, %v460_v1 }
 0x264   :  { %v552_v13 = vmul.f32 0.0, %v469_v7 }
 0x265   :  { %v564_v6 = vadd.f32 %v563_v4, %v549_v3  ;;  %v550_v9 = vmul.f32 0.0, %v461_v5 }
 0x267   :  { %v565_v12 = vadd.f32 %v564_v6, %v550_v9 }
 0x269   :  { %v566_v17 = vadd.f32 %v565_v12, %v551_v10 }
 0x26b   :  { %v567_v18 = vadd.f32 %v566_v17, %v552_v13 }
 0x26d   :  { %v568_v19 = vrot.slane %v567_v18, 4 }
 0x26f   :  { %v569_v20 = vadd.f32 %v568_v19, %v567_v18 }
 0x271   :  { %v570_v21 = vrot.slane %v569_v20, 2 }
 0x273   :  { %v571_v22 = vadd.f32 %v570_v21, %v569_v20 }
 0x275   :  { %v572_v24 = vrot.slane %v571_v22, 1 }
 0x277   :  { %v573_v25 = vadd.f32 %v572_v24, %v571_v22 }
 0x279   :  { %v574_v26 = vmul.f32 0.0625, %v573_v25 }
 0x27b   :  { %v2186_v28 = vsub.f32 %v2178_v14, %v574_v26  ;;  %v2188_v30 = vsub.f32 %v413_v16, %v574_v26  ;;  %v2191_v8 = vsub.f32 %v2176_v11, %v574_v26  ;;  %v2194_v33 = vsub.f32 %v2180_v15, %v574_v26 }
 0x27c   :  { %v2196_v34 = vsub.f32 %v426_v23, %v574_v26  ;;  %v2198_v35 = vsub.f32 %v429_v29, %v574_v26  ;;  %v2200_v36 = vsub.f32 %v434_v27, %v574_v26  ;;  %v2202_v37 = vsub.f32 %v437_v31, %v574_v26 }
 0x27d   :  { %v2204_v38 = vsub.f32 %v442_v40, %v574_v26  ;;  %v2206_v14 = vsub.f32 %v445_v46, %v574_v26  ;;  %v2208_v16 = vsub.f32 %v450_v43, %v574_v26  ;;  %v2210_v39 = vsub.f32 %v453_v48, %v574_v26 }
 0x27e   :  { %v2212_v11 = vsub.f32 %v458_v56, %v574_v26  ;;  %v588_v15 = vsub.f32 %v461_v5, %v574_v26  ;;  %v2214_v41 = vsub.f32 %v466_v2, %v574_v26  ;;  %v2216_v23 = vsub.f32 %v469_v7, %v574_v26 }
 0x27f   :  { %v593_v27 = vmul.f32 0.0, %v2191_v8  ;;  %v607_v29 = vmul.f32 %v2186_v28, %v2186_v28  ;;  %v608_v31 = vmul.f32 %v2188_v30, %v2188_v30  ;;  %v594_v40 = vmul.f32 0.0, %v2194_v33 }
 0x280   :  { %v595_v43 = vmul.f32 0.0, %v2196_v34  ;;  %v596_v45 = vmul.f32 0.0, %v2198_v35  ;;  %v597_v48 = vmul.f32 0.0, %v2200_v36  ;;  %v598_v51 = vmul.f32 0.0, %v2202_v37 }
 0x281   :  { %v609_v42 = vmul.f32 %v593_v27, %v593_v27  ;;  %v623_v44 = vadd.f32 %v608_v31, %v607_v29  ;;  %v610_v46 = vmul.f32 %v594_v40, %v594_v40  ;;  %v599_v54 = vmul.f32 0.0, %v2204_v38 }
 0x282   :  { %v611_v49 = vmul.f32 %v595_v43, %v595_v43  ;;  %v612_v52 = vmul.f32 %v596_v45, %v596_v45  ;;  %v613_v55 = vmul.f32 %v597_v48, %v597_v48  ;;  %v600_v0 = vmul.f32 0.0, %v2206_v14 }
 0x283   :  { %v624_v47 = vadd.f32 %v623_v44, %v609_v42  ;;  %v614_v1 = vmul.f32 %v598_v51, %v598_v51  ;;  %v601_v3 = vmul.f32 0.0, %v2208_v16  ;;  %v615_v4 = vmul.f32 %v599_v54, %v599_v54 }
 0x284   :  { %v602_v6 = vmul.f32 0.0, %v2210_v39  ;;  %v616_v7 = vmul.f32 %v600_v0, %v600_v0  ;;  %v603_v10 = vmul.f32 0.0, %v2212_v11  ;;  %v604_v17 = vmul.f32 0.0, %v588_v15  ;;  %v1496_v0 = vld [vmem:[%s2370_s5] ss:$0 sm:$0xff] }
 0x285   :  { %v625_v50 = vadd.f32 %v624_v47, %v610_v46  ;;  %v617_v12 = vmul.f32 %v601_v3, %v601_v3  ;;  %v605_v20 = vmul.f32 0.0, %v2214_v41  ;;  %v606_v24 = vmul.f32 0.0, %v2216_v23 }
 0x286   :  { %v618_v18 = vmul.f32 %v602_v6, %v602_v6  ;;  %v619_v21 = vmul.f32 %v603_v10, %v603_v10  ;;  %v620_v25 = vmul.f32 %v604_v17, %v604_v17 }
 0x287   :  { %v626_v53 = vadd.f32 %v625_v50, %v611_v49  ;;  %v621_v27 = vmul.f32 %v605_v20, %v605_v20  ;;  %v622_v31 = vmul.f32 %v606_v24, %v606_v24 }
 0x289   :  { %v627_v56 = vadd.f32 %v626_v53, %v612_v52  ;;  %v1495_v52 = vld [vmem:[%s2369_s4] ss:$0 sm:$0xff] }
 0x28b   :  { %v628_v2 = vadd.f32 %v627_v56, %v613_v55 }
 0x28d   :  { %v629_v5 = vadd.f32 %v628_v2, %v614_v1 }
 0x28f   :  { %v630_v9 = vadd.f32 %v629_v5, %v615_v4 }
 0x291   :  { %v631_v13 = vadd.f32 %v630_v9, %v616_v7 }
 0x293   :  { %v632_v19 = vadd.f32 %v631_v13, %v617_v12 }
 0x295   :  { %v633_v22 = vadd.f32 %v632_v19, %v618_v18 }
 0x297   :  { %v634_v26 = vadd.f32 %v633_v22, %v619_v21 }
 0x299   :  { %v635_v29 = vadd.f32 %v634_v26, %v620_v25 }
 0x29b   :  { %v636_v40 = vadd.f32 %v635_v29, %v621_v27 }
 0x29d   :  { %v637_v42 = vadd.f32 %v636_v40, %v622_v31 }
 0x29f   :  { %v638_v43 = vrot.slane %v637_v42, 4 }
 0x2a1   :  { %v639_v44 = vadd.f32 %v638_v43, %v637_v42 }
 0x2a3   :  { %v640_v45 = vrot.slane %v639_v44, 2 }
 0x2a5   :  { %v641_v46 = vadd.f32 %v640_v45, %v639_v44 }
 0x2a7   :  { %v642_v47 = vrot.slane %v641_v46, 1 }
 0x2a9   :  { %v643_v48 = vadd.f32 %v642_v47, %v641_v46 }
 0x2ab   :  { %v644_v49 = vmul.f32 0.0625, %v643_v48 }
 0x2ad   :  { %v645_v50 = vadd.f32 1e-05, %v644_v49 }
 0x2af   :  { %1847 = vrsqrt.f32 %v645_v50 }
 0x2b9   :  { %v1848_v51 = vpop.eup %1847 }
 0x2ba   :  { %v660_v53 = vmul.f32 %v1848_v51, %v588_v15  ;;  %v647_v54 = vmul.f32 %v1848_v51, %v2186_v28  ;;  %v648_v55 = vmul.f32 %v1848_v51, %v2188_v30  ;;  %v649_v56 = vmul.f32 %v1848_v51, %v2191_v8 }
 0x2bb   :  { %v650_v1 = vmul.f32 %v1848_v51, %v2194_v33  ;;  %v651_v2 = vmul.f32 %v1848_v51, %v2196_v34  ;;  %v652_v3 = vmul.f32 %v1848_v51, %v2198_v35  ;;  %v653_v4 = vmul.f32 %v1848_v51, %v2200_v36 }
 0x2bc   :  { %v683_v5 = vmul.f32 %v1495_v52, %v660_v53  ;;  %v670_v15 = vmul.f32 %v1495_v52, %v647_v54  ;;  %v671_v6 = vmul.f32 %v1495_v52, %v648_v55  ;;  %v672_v28 = vmul.f32 %v1495_v52, %v649_v56 }
 0x2bd   :  { %v673_v7 = vmul.f32 %v1495_v52, %v650_v1  ;;  %v674_v30 = vmul.f32 %v1495_v52, %v651_v2  ;;  %v675_v9 = vmul.f32 %v1495_v52, %v652_v3  ;;  %v654_v8 = vmul.f32 %v1848_v51, %v2202_v37 }
 0x2be   :  { %v693_v10 = vadd.f32 %v1496_v0, %v670_v15  ;;  %v694_v12 = vadd.f32 %v1496_v0, %v671_v6  ;;  %v695_v13 = vadd.f32 %v1496_v0, %v672_v28  ;;  %v676_v17 = vmul.f32 %v1495_v52, %v653_v4 }
 0x2bf   :  { %v696_v33 = vadd.f32 %v1496_v0, %v673_v7  ;;  %v697_v18 = vadd.f32 %v1496_v0, %v674_v30  ;;  %v698_v34 = vadd.f32 %v1496_v0, %v675_v9  ;;  %v677_v19 = vmul.f32 %v1495_v52, %v654_v8 }
 0x2c0   :  { %v709_v35 = vpack.c.bf16 %v694_v12, %v693_v10  ;;  %v699_v20 = vadd.f32 %v1496_v0, %v676_v17  ;;  %v655_v36 = vmul.f32 %v1848_v51, %v2204_v38  ;;  %v656_v21 = vmul.f32 %v1848_v51, %v2206_v14 }
 0x2c1   :  { %v710_v22 = vpack.c.bf16 %v696_v33, %v695_v13  ;;  %v711_v24 = vpack.c.bf16 %v698_v34, %v697_v18  ;;  %v700_v25 = vadd.f32 %v1496_v0, %v677_v19  ;;  %v657_v26 = vmul.f32 %v1848_v51, %v2208_v16 }
 0x2c2   :  { %1693 = vmatprep.mubr.bf16.mxu0 %v709_v35  ;;  %v678_v37 = vmul.f32 %v1495_v52, %v655_v36  ;;  %v679_v27 = vmul.f32 %v1495_v52, %v656_v21  ;;  %v658_v29 = vmul.f32 %v1848_v51, %v2210_v39  ;;  %v659_v31 = vmul.f32 %v1848_v51, %v2212_v11  ;;  %v1839_v35 = vld [vmem:[#allocation10] sm:$0xff]  }
 0x2c3   :  { %1694 = vmatmul.mubr.bf16.vlgmr.msra.gmra.mrb[16].mxu0 %v710_v22  ;;  %v712_v40 = vpack.c.bf16 %v700_v25, %v699_v20  ;;  %v680_v42 = vmul.f32 %v1495_v52, %v657_v26  ;;  %v706_v43 = vadd.f32 %v1496_v0, %v683_v5  ;;  %v661_v38 = vmul.f32 %v1848_v51, %v2214_v41  ;;  %v1840_v20 = vld [vmem:[#allocation10 + $0x8] sm:$0xff]  }
 0x2c4   :  { %1697 = vmatprep.mubr.bf16.mxu0 %v711_v24  ;;  %v701_v14 = vadd.f32 %v1496_v0, %v678_v37  ;;  %v702_v44 = vadd.f32 %v1496_v0, %v679_v27  ;;  %v681_v45 = vmul.f32 %v1495_v52, %v658_v29  ;;  %v682_v46 = vmul.f32 %v1495_v52, %v659_v31 }
 0x2c5   :  { %v703_v47 = vadd.f32 %v1496_v0, %v680_v42  ;;  %v662_v16 = vmul.f32 %v1848_v51, %v2216_v23  ;;  %v684_v48 = vmul.f32 %v1495_v52, %v661_v38  ;;  %1741 = vmatprep.subr.bf16.mxu0 %v1839_v35 }
 0x2c6   :  { %v713_v49 = vpack.c.bf16 %v702_v44, %v701_v14  ;;  %v704_v50 = vadd.f32 %v1496_v0, %v681_v45  ;;  %v705_v39 = vadd.f32 %v1496_v0, %v682_v46  ;;  %1742 = vmatpush3.bf16.msra.mxu0 %v1839_v35 }
 0x2c7   :  { %v685_v53 = vmul.f32 %v1495_v52, %v662_v16  ;;  %v707_v11 = vadd.f32 %v1496_v0, %v684_v48  ;;  %1743 = vmatprep.subr.bf16.mxu0 %v1840_v20 }
 0x2c8   :  { %v714_v54 = vpack.c.bf16 %v704_v50, %v703_v47  ;;  %v715_v55 = vpack.c.bf16 %v706_v43, %v705_v39 }
 0x2c9   :  { %v708_v56 = vadd.f32 %v1496_v0, %v685_v53 }
 0x2ca   :  { %1744 = vmatpush3.bf16.msra.mxu0 %v1840_v20 }
 0x2cb   :  { %1698 = vmatmul.mubr.bf16.gmra.mrb[20].mxu0 %v712_v40  ;;  %v716_v1 = vpack.c.bf16 %v708_v56, %v707_v11 }
 0x2cc   :  { %1701 = vmatprep.mubr.bf16.mxu0 %v713_v49 }
 0x2d3   :  { %1702 = vmatmul.mubr.bf16.gmra.mrb[24].mxu0 %v714_v54 }
 0x2d4   :  { %1705 = vmatprep.mubr.bf16.mxu0 %v715_v55 }
 0x2db   :  { %1706 = vmatmul.mubr.bf16.gmra.mrb[28].mxu0 %v716_v1 }
 0x396   :  { %v1695_v41 = vpop.f32.mrb[16].mxu0 }
 0x397   :  { %v815_v2 = vpop.f32.mrb[17].mxu0 }
 0x398   :  { %v1696_v3 = vpop.f32.mrb[18].mxu0 }
 0x399   :  { %v879_v4 = vpack.c.bf16 %v1696_v3, %v1695_v41  ;;  %v818_v23 = vpop.f32.mrb[19].mxu0 }
 0x39a   :  { %v878_v51 = vpack.c.bf16 %v818_v23, %v815_v2 }
 0x39c   :  { %1709 = vmatprep.subr.bf16.mxu1 %v878_v51 }
 0x39d   :  { %1710 = vmatpush3.bf16.msra.mxu1 %v878_v51 }
 0x39e   :  { %v1699_v5 = vpop.f32.mrb[20].mxu0  ;;  %1711 = vmatprep.subr.bf16.mxu1 %v879_v4 }
 0x39f   :  { %v831_v52 = vpop.f32.mrb[21].mxu0 }
 0x3a0   :  { %v1700_v15 = vpop.f32.mrb[22].mxu0 }
 0x3a1   :  { %v881_v6 = vpack.c.bf16 %v1700_v15, %v1699_v5  ;;  %v834_v0 = vpop.f32.mrb[23].mxu0  ;;  %1712 = vmatpush3.bf16.msra.mxu1 %v879_v4 }
 0x3a2   :  { %v880_v28 = vpack.c.bf16 %v834_v0, %v831_v52 }
 0x3a4   :  { %1713 = vmatprep.subr.bf16.mxu1 %v880_v28 }
 0x3a5   :  { %1714 = vmatpush3.bf16.msra.mxu1 %v880_v28 }
 0x3a6   :  { %v1703_v7 = vpop.f32.mrb[24].mxu0  ;;  %1715 = vmatprep.subr.bf16.mxu1 %v881_v6 }
 0x3a7   :  { %v847_v30 = vpop.f32.mrb[25].mxu0 }
 0x3a8   :  { %v1704_v9 = vpop.f32.mrb[26].mxu0 }
 0x3a9   :  { %v883_v8 = vpack.c.bf16 %v1704_v9, %v1703_v7  ;;  %v850_v10 = vpop.f32.mrb[27].mxu0  ;;  %1716 = vmatpush3.bf16.msra.mxu1 %v881_v6 }
 0x3aa   :  { %v882_v12 = vpack.c.bf16 %v850_v10, %v847_v30 }
 0x3ac   :  { %1717 = vmatprep.subr.bf16.mxu1 %v882_v12 }
 0x3ad   :  { %1718 = vmatpush3.bf16.msra.mxu1 %v882_v12 }
 0x3ae   :  { %v1707_v13 = vpop.f32.mrb[28].mxu0  ;;  %1719 = vmatprep.subr.bf16.mxu1 %v883_v8 }
 0x3af   :  { %v863_v17 = vpop.f32.mrb[29].mxu0 }
 0x3b0   :  { %v1708_v33 = vpop.f32.mrb[30].mxu0 }
 0x3b1   :  { %v885_v18 = vpack.c.bf16 %v1708_v33, %v1707_v13  ;;  %v866_v34 = vpop.f32.mrb[31].mxu0  ;;  %1720 = vmatpush3.bf16.msra.mxu1 %v883_v8 }
 0x3b2   :  { %v884_v19 = vpack.c.bf16 %v866_v34, %v863_v17 }
 0x3b4   :  { %1721 = vmatprep.subr.bf16.mxu1 %v884_v19 }
 0x3b5   :  { %1722 = vmatpush3.bf16.msra.mxu1 %v884_v19 }
 0x3b6   :  { %1723 = vmatprep.subr.bf16.mxu1 %v885_v18 }
 0x3b9   :  { %1724 = vmatpush3.bf16.msra.mxu1 %v885_v18 }
 0x3bc   :  { %1726 = vmatmul.mubr.bf16.vlgmr.msra.gmra.mrb[16].mxu1 %v2151_v57  ;;  %v1841_v57 = vld [vmem:[#allocation10 + $0x10] sm:$0xff]  }
 0x3bd   :  { %1729 = vmatprep.mubr.bf16.mxu1 %v2153_v58  ;;  %1745 = vmatprep.subr.bf16.mxu0 %v1841_v57  ;;  %v1842_v58 = vld [vmem:[#allocation10 + $0x18] sm:$0xff]  }
 0x3be   :  { %1746 = vmatpush3.bf16.msra.mxu0 %v1841_v57 }
 0x3bf   :  { %1747 = vmatprep.subr.bf16.mxu0 %v1842_v58 }
 0x3c2   :  { %1748 = vmatpush3.bf16.msra.mxu0 %v1842_v58 }
 0x3c4   :  { %1730 = vmatmul.mubr.bf16.gmra.mrb[20].mxu1 %v2157_v59  ;;  %v1843_v59 = vld [vmem:[#allocation10 + $0x20] sm:$0xff]  }
 0x3c5   :  { %1733 = vmatprep.mubr.bf16.mxu1 %v2159_v60  ;;  %1749 = vmatprep.subr.bf16.mxu0 %v1843_v59  ;;  %v1844_v60 = vld [vmem:[#allocation10 + $0x28] sm:$0xff]  }
 0x3c6   :  { %1750 = vmatpush3.bf16.msra.mxu0 %v1843_v59 }
 0x3c7   :  { %1751 = vmatprep.subr.bf16.mxu0 %v1844_v60 }
 0x3ca   :  { %1752 = vmatpush3.bf16.msra.mxu0 %v1844_v60 }
 0x3cc   :  { %1734 = vmatmul.mubr.bf16.gmra.mrb[24].mxu1 %v2163_v61  ;;  %v1845_v61 = vld [vmem:[#allocation10 + $0x30] sm:$0xff]  }
 0x3cd   :  { %1737 = vmatprep.mubr.bf16.mxu1 %v2165_v62  ;;  %1753 = vmatprep.subr.bf16.mxu0 %v1845_v61  ;;  %v1505_v62 = vld [vmem:[%s2372_s7] ss:$0 sm:$0xff] }
 0x3ce   :  { %1754 = vmatpush3.bf16.msra.mxu0 %v1845_v61 }
 0x3d4   :  { %1738 = vmatmul.mubr.bf16.gmra.mrb[28].mxu1 %v2169_v63 }
 0x3d5   :  { %1789 = vmatprep.mubr.bf16.mxu1 %v2148_v32  ;;  %v1846_v32 = vld [vmem:[#allocation10 + $0x38] sm:$0xff]  }
 0x3d6   :  { %1755 = vmatprep.subr.bf16.mxu0 %v1846_v32 }
 0x3d7   :  { %1756 = vmatpush3.bf16.msra.mxu0 %v1846_v32 }
 0x48f   :  { %v1727_v63 = vpop.f32.mrb[16].mxu1 }
 0x490   :  { %v927_v36 = vpop.f32.mrb[17].mxu1  ;;  %v2267_v21 = vadd.f32 %v1727_v63, %v1505_v62 }
 0x491   :  { %v1728_v22 = vpop.f32.mrb[18].mxu1  ;;  %v2269_v25 = vadd.f32 %v1505_v62, %v927_v36 }
 0x492   :  { %v930_v24 = vpop.f32.mrb[19].mxu1  ;;  %v2271_v26 = vadd.f32 %v1728_v22, %v1505_v62  ;;  %v992_v27 = vmul.f32 0.0, %v2267_v21 }
 0x493   :  { %v931_v37 = vadd.f32 %v1505_v62, %v930_v24 }
 0x494   :  { %v993_v31 = vmul.f32 0.0, %v2271_v26 }
 0x495   :  { %v1006_v29 = vadd.f32 %v931_v37, %v2269_v25 }
 0x497   :  { %v1007_v40 = vadd.f32 %v1006_v29, %v992_v27  ;;  %v1731_v42 = vpop.f32.mrb[20].mxu1 }
 0x498   :  { %v943_v43 = vpop.f32.mrb[21].mxu1  ;;  %v952_v46 = vadd.f32 %v1731_v42, %v1505_v62 }
 0x499   :  { %v944_v38 = vadd.f32 %v1505_v62, %v943_v43  ;;  %v1008_v14 = vadd.f32 %v1007_v40, %v993_v31  ;;  %v1732_v44 = vpop.f32.mrb[22].mxu1 }
 0x49a   :  { %v946_v45 = vpop.f32.mrb[23].mxu1  ;;  %v955_v49 = vadd.f32 %v1732_v44, %v1505_v62  ;;  %v996_v39 = vmul.f32 0.0, %v952_v46 }
 0x49b   :  { %v994_v47 = vmul.f32 0.0, %v944_v38  ;;  %v947_v16 = vadd.f32 %v1505_v62, %v946_v45 }
 0x49c   :  { %v997_v55 = vmul.f32 0.0, %v955_v49 }
 0x49d   :  { %v1009_v48 = vadd.f32 %v1008_v14, %v994_v47  ;;  %v995_v50 = vmul.f32 0.0, %v947_v16 }
 0x49f   :  { %v1010_v53 = vadd.f32 %v1009_v48, %v995_v50  ;;  %v1735_v11 = vpop.f32.mrb[24].mxu1 }
 0x4a0   :  { %v959_v54 = vpop.f32.mrb[25].mxu1  ;;  %v968_v3 = vadd.f32 %v1735_v11, %v1505_v62 }
 0x4a1   :  { %v1011_v56 = vadd.f32 %v1010_v53, %v996_v39  ;;  %v960_v1 = vadd.f32 %v1505_v62, %v959_v54  ;;  %v1736_v41 = vpop.f32.mrb[26].mxu1 }
 0x4a2   :  { %v962_v2 = vpop.f32.mrb[27].mxu1  ;;  %v971_v52 = vadd.f32 %v1736_v41, %v1505_v62  ;;  %v1000_v6 = vmul.f32 0.0, %v968_v3 }
 0x4a3   :  { %v998_v4 = vmul.f32 0.0, %v960_v1  ;;  %v1012_v23 = vadd.f32 %v1011_v56, %v997_v55  ;;  %v963_v51 = vadd.f32 %v1505_v62, %v962_v2 }
 0x4a4   :  { %v1001_v30 = vmul.f32 0.0, %v971_v52 }
 0x4a5   :  { %v1013_v5 = vadd.f32 %v1012_v23, %v998_v4  ;;  %v999_v15 = vmul.f32 0.0, %v963_v51 }
 0x4a7   :  { %v1014_v0 = vadd.f32 %v1013_v5, %v999_v15  ;;  %v1739_v28 = vpop.f32.mrb[28].mxu1 }
 0x4a8   :  { %v975_v7 = vpop.f32.mrb[29].mxu1  ;;  %v984_v13 = vadd.f32 %v1739_v28, %v1505_v62 }
 0x4a9   :  { %v1015_v9 = vadd.f32 %v1014_v0, %v1000_v6  ;;  %v976_v8 = vadd.f32 %v1505_v62, %v975_v7  ;;  %v1740_v10 = vpop.f32.mrb[30].mxu1 }
 0x4aa   :  { %v978_v12 = vpop.f32.mrb[31].mxu1  ;;  %v987_v19 = vadd.f32 %v1740_v10, %v1505_v62  ;;  %v1004_v20 = vmul.f32 0.0, %v984_v13 }
 0x4ab   :  { %v1002_v17 = vmul.f32 0.0, %v976_v8  ;;  %v1016_v33 = vadd.f32 %v1015_v9, %v1001_v30  ;;  %v979_v18 = vadd.f32 %v1505_v62, %v978_v12 }
 0x4ac   :  { %v1005_v58 = vmul.f32 0.0, %v987_v19 }
 0x4ad   :  { %v1017_v34 = vadd.f32 %v1016_v33, %v1002_v17  ;;  %v1003_v35 = vmul.f32 0.0, %v979_v18 }
 0x4af   :  { %v1018_v57 = vadd.f32 %v1017_v34, %v1003_v35 }
 0x4b1   :  { %v1019_v59 = vadd.f32 %v1018_v57, %v1004_v20 }
 0x4b3   :  { %v1020_v60 = vadd.f32 %v1019_v59, %v1005_v58 }
 0x4b5   :  { %v1021_v61 = vrot.slane %v1020_v60, 4 }
 0x4b7   :  { %v1022_v32 = vadd.f32 %v1021_v61, %v1020_v60 }
 0x4b9   :  { %v1023_v63 = vrot.slane %v1022_v32, 2 }
 0x4bb   :  { %v1024_v36 = vadd.f32 %v1023_v63, %v1022_v32 }
 0x4bd   :  { %v1025_v22 = vrot.slane %v1024_v36, 1 }
 0x4bf   :  { %v1026_v24 = vadd.f32 %v1025_v22, %v1024_v36 }
 0x4c1   :  { %v1027_v27 = vmul.f32 0.0625, %v1026_v24 }
 0x4c3   :  { %v2277_v29 = vsub.f32 %v2269_v25, %v1027_v27  ;;  %v2279_v31 = vsub.f32 %v931_v37, %v1027_v27  ;;  %v2282_v62 = vsub.f32 %v2267_v21, %v1027_v27  ;;  %v2285_v40 = vsub.f32 %v2271_v26, %v1027_v27 }
 0x4c4   :  { %v2287_v42 = vsub.f32 %v944_v38, %v1027_v27  ;;  %v2289_v43 = vsub.f32 %v947_v16, %v1027_v27  ;;  %v2291_v14 = vsub.f32 %v952_v46, %v1027_v27  ;;  %v2293_v44 = vsub.f32 %v955_v49, %v1027_v27 }
 0x4c5   :  { %v2295_v45 = vsub.f32 %v960_v1, %v1027_v27  ;;  %v2297_v25 = vsub.f32 %v963_v51, %v1027_v27  ;;  %v2299_v37 = vsub.f32 %v968_v3, %v1027_v27  ;;  %v2301_v47 = vsub.f32 %v971_v52, %v1027_v27 }
 0x4c6   :  { %v2303_v21 = vsub.f32 %v976_v8, %v1027_v27  ;;  %v1041_v26 = vsub.f32 %v979_v18, %v1027_v27  ;;  %v2305_v48 = vsub.f32 %v984_v13, %v1027_v27  ;;  %v2307_v38 = vsub.f32 %v987_v19, %v1027_v27 }
 0x4c7   :  { %v1046_v46 = vmul.f32 0.0, %v2282_v62  ;;  %v1060_v16 = vmul.f32 %v2277_v29, %v2277_v29  ;;  %v1061_v49 = vmul.f32 %v2279_v31, %v2279_v31  ;;  %v1047_v50 = vmul.f32 0.0, %v2285_v40 }
 0x4c8   :  { %v1048_v53 = vmul.f32 0.0, %v2287_v42  ;;  %v1049_v54 = vmul.f32 0.0, %v2289_v43  ;;  %v1050_v1 = vmul.f32 0.0, %v2291_v14  ;;  %v1051_v3 = vmul.f32 0.0, %v2293_v44 }
 0x4c9   :  { %v1062_v39 = vmul.f32 %v1046_v46, %v1046_v46  ;;  %v1076_v11 = vadd.f32 %v1061_v49, %v1060_v16  ;;  %v1063_v55 = vmul.f32 %v1047_v50, %v1047_v50  ;;  %v1052_v51 = vmul.f32 0.0, %v2295_v45 }
 0x4ca   :  { %v1064_v41 = vmul.f32 %v1048_v53, %v1048_v53  ;;  %v1065_v4 = vmul.f32 %v1049_v54, %v1049_v54  ;;  %v1066_v5 = vmul.f32 %v1050_v1, %v1050_v1  ;;  %v1053_v15 = vmul.f32 0.0, %v2297_v25 }
 0x4cb   :  { %v1077_v56 = vadd.f32 %v1076_v11, %v1062_v39  ;;  %v1067_v6 = vmul.f32 %v1051_v3, %v1051_v3  ;;  %v1054_v28 = vmul.f32 0.0, %v2299_v37  ;;  %v1068_v7 = vmul.f32 %v1052_v51, %v1052_v51  ;;  %v1506_v11 = vld [vmem:[%s2373_s8] ss:$0 sm:$0xff] }
 0x4cc   :  { %v1055_v9 = vmul.f32 0.0, %v2301_v47  ;;  %v1069_v8 = vmul.f32 %v1053_v15, %v1053_v15  ;;  %v1056_v12 = vmul.f32 0.0, %v2303_v21  ;;  %v1057_v33 = vmul.f32 0.0, %v1041_v26 }
 0x4cd   :  { %v1078_v2 = vadd.f32 %v1077_v56, %v1063_v55  ;;  %v1070_v13 = vmul.f32 %v1054_v28, %v1054_v28  ;;  %v1058_v19 = vmul.f32 0.0, %v2305_v48  ;;  %v1059_v57 = vmul.f32 0.0, %v2307_v38 }
 0x4ce   :  { %v1071_v18 = vmul.f32 %v1055_v9, %v1055_v9  ;;  %v1072_v35 = vmul.f32 %v1056_v12, %v1056_v12  ;;  %v1073_v58 = vmul.f32 %v1057_v33, %v1057_v33 }
 0x4cf   :  { %v1079_v23 = vadd.f32 %v1078_v2, %v1064_v41  ;;  %v1074_v60 = vmul.f32 %v1058_v19, %v1058_v19  ;;  %v1075_v32 = vmul.f32 %v1059_v57, %v1059_v57  ;;  %v1507_v41 = vld [vmem:[%s2374_s9] ss:$0 sm:$0xff] }
 0x4d1   :  { %v1080_v52 = vadd.f32 %v1079_v23, %v1065_v4 }
 0x4d3   :  { %v1081_v0 = vadd.f32 %v1080_v52, %v1066_v5 }
 0x4d5   :  { %v1082_v30 = vadd.f32 %v1081_v0, %v1067_v6 }
 0x4d7   :  { %v1083_v10 = vadd.f32 %v1082_v30, %v1068_v7 }
 0x4d9   :  { %v1084_v17 = vadd.f32 %v1083_v10, %v1069_v8 }
 0x4db   :  { %v1085_v34 = vadd.f32 %v1084_v17, %v1070_v13 }
 0x4dd   :  { %v1086_v20 = vadd.f32 %v1085_v34, %v1071_v18 }
 0x4df   :  { %v1087_v59 = vadd.f32 %v1086_v20, %v1072_v35 }
 0x4e1   :  { %v1088_v61 = vadd.f32 %v1087_v59, %v1073_v58 }
 0x4e3   :  { %v1089_v63 = vadd.f32 %v1088_v61, %v1074_v60 }
 0x4e5   :  { %v1090_v36 = vadd.f32 %v1089_v63, %v1075_v32 }
 0x4e7   :  { %v1091_v22 = vrot.slane %v1090_v36, 4 }
 0x4e9   :  { %v1092_v24 = vadd.f32 %v1091_v22, %v1090_v36 }
 0x4eb   :  { %v1093_v27 = vrot.slane %v1092_v24, 2 }
 0x4ed   :  { %v1094_v46 = vadd.f32 %v1093_v27, %v1092_v24 }
 0x4ef   :  { %v1095_v16 = vrot.slane %v1094_v46, 1 }
 0x4f1   :  { %v1096_v49 = vadd.f32 %v1095_v16, %v1094_v46 }
 0x4f3   :  { %v1097_v50 = vmul.f32 0.0625, %v1096_v49 }
 0x4f5   :  { %v1098_v39 = vadd.f32 1e-05, %v1097_v50 }
 0x4f7   :  { %1849 = vrsqrt.f32 %v1098_v39 }
 0x501   :  { %v1850_v53 = vpop.eup %1849 }
 0x502   :  { %v1113_v54 = vmul.f32 %v1850_v53, %v1041_v26  ;;  %v1100_v55 = vmul.f32 %v1850_v53, %v2277_v29  ;;  %v1101_v56 = vmul.f32 %v1850_v53, %v2279_v31  ;;  %v1102_v1 = vmul.f32 %v1850_v53, %v2282_v62 }
 0x503   :  { %v1103_v2 = vmul.f32 %v1850_v53, %v2285_v40  ;;  %v1104_v3 = vmul.f32 %v1850_v53, %v2287_v42  ;;  %v1105_v4 = vmul.f32 %v1850_v53, %v2289_v43  ;;  %v1106_v23 = vmul.f32 %v1850_v53, %v2291_v14 }
 0x504   :  { %v1136_v51 = vmul.f32 %v1506_v11, %v1113_v54  ;;  %v1123_v26 = vmul.f32 %v1506_v11, %v1100_v55  ;;  %v1124_v5 = vmul.f32 %v1506_v11, %v1101_v56  ;;  %v1125_v29 = vmul.f32 %v1506_v11, %v1102_v1 }
 0x505   :  { %v1126_v52 = vmul.f32 %v1506_v11, %v1103_v2  ;;  %v1127_v31 = vmul.f32 %v1506_v11, %v1104_v3  ;;  %v1128_v15 = vmul.f32 %v1506_v11, %v1105_v4  ;;  %v1107_v62 = vmul.f32 %v1850_v53, %v2293_v44 }
 0x506   :  { %v1146_v6 = vadd.f32 %v1507_v41, %v1123_v26  ;;  %v1147_v0 = vadd.f32 %v1507_v41, %v1124_v5  ;;  %v1148_v28 = vadd.f32 %v1507_v41, %v1125_v29  ;;  %v1129_v7 = vmul.f32 %v1506_v11, %v1106_v23 }
 0x507   :  { %v1149_v40 = vadd.f32 %v1507_v41, %v1126_v52  ;;  %v1150_v30 = vadd.f32 %v1507_v41, %v1127_v31  ;;  %v1151_v42 = vadd.f32 %v1507_v41, %v1128_v15  ;;  %v1130_v9 = vmul.f32 %v1506_v11, %v1107_v62 }
 0x508   :  { %v1162_v43 = vpack.c.bf16 %v1147_v0, %v1146_v6  ;;  %v1152_v8 = vadd.f32 %v1507_v41, %v1129_v7  ;;  %v1108_v14 = vmul.f32 %v1850_v53, %v2295_v45  ;;  %v1109_v10 = vmul.f32 %v1850_v53, %v2297_v25  ;;  %v1851_v6 = vld [vmem:[#allocation2 + $0x8] sm:$0xff]   ;;  %v1852_v0 = vld [vmem:[#allocation2 + $0x10] sm:$0xff]   ;;  %v1854_v7 = vld [vmem:[#allocation2 + $0x20] sm:$0xff]  }
 0x509   :  { %v1163_v12 = vpack.c.bf16 %v1149_v40, %v1148_v28  ;;  %v1164_v13 = vpack.c.bf16 %v1151_v42, %v1150_v30  ;;  %v1153_v17 = vadd.f32 %v1507_v41, %v1130_v9  ;;  %v1110_v33 = vmul.f32 %v1850_v53, %v2299_v37  ;;  %v1853_v28 = vld [vmem:[#allocation2 + $0x18] sm:$0xff]   ;;  %v1855_v40 = vld [vmem:[#allocation2 + $0x28] sm:$0xff]   ;;  %v1856_v30 = vld [vmem:[#allocation2 + $0x30] sm:$0xff]  }
 0x50a   :  { %1757 = vmatprep.mubr.bf16.mxu0 %v1162_v43  ;;  %v1131_v44 = vmul.f32 %v1506_v11, %v1108_v14  ;;  %v1132_v18 = vmul.f32 %v1506_v11, %v1109_v10  ;;  %v1111_v34 = vmul.f32 %v1850_v53, %v2301_v47  ;;  %v1112_v19 = vmul.f32 %v1850_v53, %v2303_v21  ;;  %v1857_v42 = vld [vmem:[#allocation2 + $0x38] sm:$0xff]   ;;  %v1516_v9 = vld [vmem:[%s2376_s11] ss:$0 sm:$0xff]  ;;  %s2007_s11 = smov [#allocation11]  }
 0x50b   :  { %1758 = vmatmul.mubr.bf16.vlgmr.msra.gmra.mrb[32].mxu0 %v1163_v12  ;;  %v1165_v35 = vpack.c.bf16 %v1153_v17, %v1152_v8  ;;  %v1133_v20 = vmul.f32 %v1506_v11, %v1110_v33  ;;  %v1159_v57 = vadd.f32 %v1507_v41, %v1136_v51  ;;  %v1114_v45 = vmul.f32 %v1850_v53, %v2305_v48  ;;  %s1464_s0 = sshll.u32 %s2007_s11, 4  ;;  %s1465_s0 = int_to_ptr.vmem [resolvable:$true] %s1464_s0 }
 0x50c   :  { %1761 = vmatprep.mubr.bf16.mxu0 %v1164_v13  ;;  %v1154_v25 = vadd.f32 %v1507_v41, %v1131_v44  ;;  %v1155_v58 = vadd.f32 %v1507_v41, %v1132_v18  ;;  %v1134_v59 = vmul.f32 %v1506_v11, %v1111_v34  ;;  %v1135_v60 = vmul.f32 %v1506_v11, %v1112_v19  ;;  %s1968_s20 = scalar_lea.vmem %s1465_s0, 2048  ;;  %p1973_p13 = scmp.lt.s32.totalorder %s1465_s0, %s1465_s0 }
 0x50d   :  { %v1156_v61 = vadd.f32 %v1507_v41, %v1133_v20  ;;  %v1115_v37 = vmul.f32 %v1850_v53, %v2307_v38  ;;  %v1137_v32 = vmul.f32 %v1506_v11, %v1114_v45  ;;  %p1969_p12 = scmp.ne.s32.totalorder %s1465_s0, %s1968_s20  ;;  %p1974_p0 = scmp.lt.s32.totalorder %s1968_s20, %s1968_s20 }
 0x50e   :  { %v1166_v63 = vpack.c.bf16 %v1155_v58, %v1154_v25  ;;  %v1157_v36 = vadd.f32 %v1507_v41, %v1134_v59  ;;  %v1158_v47 = vadd.f32 %v1507_v41, %v1135_v60 }
 0x50f   :  { %v1138_v22 = vmul.f32 %v1506_v11, %v1115_v37  ;;  %v1160_v21 = vadd.f32 %v1507_v41, %v1137_v32  ;;  %p1975_p1 = por %p1974_p0, %p1973_p13 }
 0x510   :  { %v1167_v24 = vpack.c.bf16 %v1157_v36, %v1156_v61  ;;  %v1168_v27 = vpack.c.bf16 %v1159_v57, %v1158_v47 }
 0x511   :  { %v1161_v46 = vadd.f32 %v1507_v41, %v1138_v22  ;;  %p1976_p2 = pnand %p1975_p1, %p1969_p12 }
 0x513   :  { %1762 = vmatmul.mubr.bf16.gmra.mrb[36].mxu0 %v1165_v35  ;;  %v1169_v16 = vpack.c.bf16 %v1161_v46, %v1160_v21 }
 0x514   :  { %1765 = vmatprep.mubr.bf16.mxu0 %v1166_v63 }
 0x51b   :  { %1766 = vmatmul.mubr.bf16.gmra.mrb[40].mxu0 %v1167_v24 }
 0x51c   :  { %1769 = vmatprep.mubr.bf16.mxu0 %v1168_v27 }
 0x523   :  { %1770 = vmatmul.mubr.bf16.gmra.mrb[44].mxu0 %v1169_v16 }
 0x5de   :  { %v1759_v48 = vpop.f32.mrb[32].mxu0 }
 0x5df   :  { %v1268_v49 = vpop.f32.mrb[33].mxu0 }
 0x5e0   :  { %v1760_v50 = vpop.f32.mrb[34].mxu0 }
 0x5e1   :  { %v1332_v39 = vpack.c.bf16 %v1760_v50, %v1759_v48  ;;  %v1271_v38 = vpop.f32.mrb[35].mxu0 }
 0x5e2   :  { %v1331_v53 = vpack.c.bf16 %v1271_v38, %v1268_v49 }
 0x5e4   :  { %1773 = vmatprep.subr.bf16.mxu1 %v1331_v53 }
 0x5e5   :  { %1774 = vmatpush3.bf16.msra.mxu1 %v1331_v53 }
 0x5e6   :  { %v1763_v54 = vpop.f32.mrb[36].mxu0  ;;  %1775 = vmatprep.subr.bf16.mxu1 %v1332_v39 }
 0x5e7   :  { %v1284_v11 = vpop.f32.mrb[37].mxu0 }
 0x5e8   :  { %v1764_v55 = vpop.f32.mrb[38].mxu0 }
 0x5e9   :  { %v1334_v56 = vpack.c.bf16 %v1764_v55, %v1763_v54  ;;  %v1287_v1 = vpop.f32.mrb[39].mxu0  ;;  %1776 = vmatpush3.bf16.msra.mxu1 %v1332_v39 }
 0x5ea   :  { %v1333_v41 = vpack.c.bf16 %v1287_v1, %v1284_v11 }
 0x5ec   :  { %1777 = vmatprep.subr.bf16.mxu1 %v1333_v41 }
 0x5ed   :  { %1778 = vmatpush3.bf16.msra.mxu1 %v1333_v41 }
 0x5ee   :  { %v1767_v2 = vpop.f32.mrb[40].mxu0  ;;  %1779 = vmatprep.subr.bf16.mxu1 %v1334_v56 }
 0x5ef   :  { %v1300_v3 = vpop.f32.mrb[41].mxu0 }
 0x5f0   :  { %v1768_v4 = vpop.f32.mrb[42].mxu0 }
 0x5f1   :  { %v1336_v23 = vpack.c.bf16 %v1768_v4, %v1767_v2  ;;  %v1303_v51 = vpop.f32.mrb[43].mxu0  ;;  %1780 = vmatpush3.bf16.msra.mxu1 %v1334_v56 }
 0x5f2   :  { %v1335_v26 = vpack.c.bf16 %v1303_v51, %v1300_v3 }
 0x5f4   :  { %1781 = vmatprep.subr.bf16.mxu1 %v1335_v26 }
 0x5f5   :  { %1782 = vmatpush3.bf16.msra.mxu1 %v1335_v26 }
 0x5f6   :  { %v1771_v5 = vpop.f32.mrb[44].mxu0  ;;  %1783 = vmatprep.subr.bf16.mxu1 %v1336_v23 }
 0x5f7   :  { %v1316_v29 = vpop.f32.mrb[45].mxu0 }
 0x5f8   :  { %v1772_v52 = vpop.f32.mrb[46].mxu0 }
 0x5f9   :  { %v1338_v31 = vpack.c.bf16 %v1772_v52, %v1771_v5  ;;  %v1319_v15 = vpop.f32.mrb[47].mxu0  ;;  %1784 = vmatpush3.bf16.msra.mxu1 %v1336_v23 }
 0x5fa   :  { %v1337_v62 = vpack.c.bf16 %v1319_v15, %v1316_v29 }
 0x5fc   :  { %1785 = vmatprep.subr.bf16.mxu1 %v1337_v62 }
 0x5fd   :  { %1786 = vmatpush3.bf16.msra.mxu1 %v1337_v62 }
 0x5fe   :  { %1787 = vmatprep.subr.bf16.mxu1 %v1338_v31 }
 0x601   :  { %1788 = vmatpush3.bf16.msra.mxu1 %v1338_v31 }
 0x604   :  { %1790 = vmatmul.mubr.bf16.vlgmr.msra.gmra.mrb[32].mxu1 %v1851_v6 }
 0x605   :  { %1793 = vmatprep.mubr.bf16.mxu1 %v1852_v0 }
 0x60c   :  { %1794 = vmatmul.mubr.bf16.gmra.mrb[36].mxu1 %v1853_v28 }
 0x60d   :  { %1797 = vmatprep.mubr.bf16.mxu1 %v1854_v7 }
 0x614   :  { %1798 = vmatmul.mubr.bf16.gmra.mrb[40].mxu1 %v1855_v40 }
 0x615   :  { %1801 = vmatprep.mubr.bf16.mxu1 %v1856_v30 }
 0x61c   :  { %1802 = vmatmul.mubr.bf16.gmra.mrb[44].mxu1 %v1857_v42 }
 0x6d7   :  { %v1791_v43 = vpop.f32.mrb[32].mxu1 }
 0x6d8   :  { %v1389_v8 = vadd.f32 %v1791_v43, %v1516_v9  ;;  %v1380_v14 = vpop.f32.mrb[33].mxu1 }
 0x6d9   :  { %v1381_v10 = vadd.f32 %v1516_v9, %v1380_v14  ;;  %v1792_v12 = vpop.f32.mrb[34].mxu1 }
 0x6da   :  { %1445 = vst [vmem:[#allocation11 + $0x10] sm:$0xff] %v1389_v8  ;;  %v1392_v13 = vadd.f32 %v1792_v12, %v1516_v9  ;;  %v1383_v17 = vpop.f32.mrb[35].mxu1 }
 0x6db   :  { %1443 = vst [vmem:[#allocation11] sm:$0xff] %v1381_v10  ;;  %v1384_v33 = vadd.f32 %v1516_v9, %v1383_v17 }
 0x6dc   :  { %1446 = vst [vmem:[#allocation11 + $0x18] sm:$0xff] %v1392_v13 }
 0x6dd   :  { %1444 = vst [vmem:[#allocation11 + $0x8] sm:$0xff] %v1384_v33 }
 0x6df   :  { %v1795_v44 = vpop.f32.mrb[36].mxu1 }
 0x6e0   :  { %v1405_v18 = vadd.f32 %v1795_v44, %v1516_v9  ;;  %v1396_v34 = vpop.f32.mrb[37].mxu1 }
 0x6e1   :  { %v1397_v19 = vadd.f32 %v1516_v9, %v1396_v34  ;;  %v1796_v35 = vpop.f32.mrb[38].mxu1 }
 0x6e2   :  { %1449 = vst [vmem:[#allocation11 + $0x30] sm:$0xff] %v1405_v18  ;;  %v1408_v20 = vadd.f32 %v1796_v35, %v1516_v9  ;;  %v1399_v57 = vpop.f32.mrb[39].mxu1 }
 0x6e3   :  { %1447 = vst [vmem:[#allocation11 + $0x20] sm:$0xff] %v1397_v19  ;;  %v1400_v45 = vadd.f32 %v1516_v9, %v1399_v57 }
 0x6e4   :  { %1450 = vst [vmem:[#allocation11 + $0x38] sm:$0xff] %v1408_v20 }
 0x6e5   :  { %1448 = vst [vmem:[#allocation11 + $0x28] sm:$0xff] %v1400_v45 }
 0x6e7   :  { %v1799_v25 = vpop.f32.mrb[40].mxu1 }
 0x6e8   :  { %v1421_v58 = vadd.f32 %v1799_v25, %v1516_v9  ;;  %v1412_v59 = vpop.f32.mrb[41].mxu1 }
 0x6e9   :  { %v1413_v60 = vadd.f32 %v1516_v9, %v1412_v59  ;;  %v1800_v61 = vpop.f32.mrb[42].mxu1 }
 0x6ea   :  { %1453 = vst [vmem:[#allocation11 + $0x50] sm:$0xff] %v1421_v58  ;;  %v1424_v37 = vadd.f32 %v1800_v61, %v1516_v9  ;;  %v1415_v32 = vpop.f32.mrb[43].mxu1 }
 0x6eb   :  { %1451 = vst [vmem:[#allocation11 + $0x40] sm:$0xff] %v1413_v60  ;;  %v1416_v63 = vadd.f32 %v1516_v9, %v1415_v32 }
 0x6ec   :  { %1454 = vst [vmem:[#allocation11 + $0x58] sm:$0xff] %v1424_v37 }
 0x6ed   :  { %1452 = vst [vmem:[#allocation11 + $0x48] sm:$0xff] %v1416_v63 }
 0x6ef   :  { %v1803_v36 = vpop.f32.mrb[44].mxu1 }
 0x6f0   :  { %v1437_v47 = vadd.f32 %v1803_v36, %v1516_v9  ;;  %v1428_v22 = vpop.f32.mrb[45].mxu1 }
 0x6f1   :  { %v1429_v21 = vadd.f32 %v1516_v9, %v1428_v22  ;;  %v1804_v24 = vpop.f32.mrb[46].mxu1 }
 0x6f2   :  { %1457 = vst [vmem:[#allocation11 + $0x70] sm:$0xff] %v1437_v47  ;;  %v1440_v27 = vadd.f32 %v1804_v24, %v1516_v9  ;;  %v1431_v46 = vpop.f32.mrb[47].mxu1 }
 0x6f3   :  { %1455 = vst [vmem:[#allocation11 + $0x60] sm:$0xff] %v1429_v21  ;;  %v1432_v16 = vadd.f32 %v1516_v9, %v1431_v46 }
 0x6f4   :  { %1458 = vst [vmem:[#allocation11 + $0x78] sm:$0xff] %v1440_v27 }
 0x6f5   :  { %1456 = vst [vmem:[#allocation11 + $0x68] sm:$0xff] %v1432_v16 }
 0x6f6   :  { %1979 = shalt.err (!%p1976_p2)
}
 0x6f7   :  { %s1980_s6 = scalar_lea.hbm %s2377_s12, 2048 }
 0x6f8   :  { %p1981_p3 = scmp.ne.s32.totalorder %s2377_s12, %s1980_s6  ;;  %p1984_p4 = scmp.lt.u32.totalorder %s1980_s6, %s2377_s12 }
 0x6fa   :  { %p1986_p5 = pnand %p1984_p4, %p1981_p3 }
 0x6fc   :  { %1989 = shalt.err (!%p1986_p5)
}
 0x6fd   :  { %1470 = dma.vmem_to_hbm [thread:$0]  %s1465_s0, 2048, %s2377_s12, [#allocation4], %s1999_s13, %s1999_s13, %s2000_s14  }
 0x6fe   :  { %1996 = dma.done.wait [#allocation4], 2048  }
 0x6ff   :  { %1997 = vsyncadd [#allocation4], 4294965248 }
 0x700   :  { %1474 = vsyncpa [#allocation3], 1 }
 0x701   :  { %1475 = vsyncpa [#allocation6], 1 }
 0x702   :  { %1476 = vsyncpa [#allocation9], 1 }
 0x703   :  { %1477 = vsyncpa [#allocation4], 1 }

</bundles_post_ra>
